<compile_context>
chip_gen: v6e
topology: v6e:2x2x1
jax: 0.10.0
libtpu: 0.0.40
codegen_flags: <defaults>
</compile_context>

<pallas_src>
import jax
import jax.numpy as jnp
from jax import lax
from jax.experimental import pallas as pl
from jax.experimental.pallas import tpu as pltpu

LANES = 128        # lane tile: output-channel padding target
SUBLANES = 16      # bf16 sublane tile (also satisfies the f32 (8,128) rule)
_TM_MAX = 2048     # rows per grid step


def _round_up(x, m):
    return (x + m - 1) // m * m


def _pick_tile(m):
    """Choose (tile_M, padded_M) for the row (M) grid axis.

    - multiple of 16 (bf16 sublane tile)
    - >= 2 grid steps whenever m allows, so the 'parallel' axis shards across v7x's 2 TCs
    - capped at _TM_MAX so per-step DMA is large vs. fixed grid-step overhead while
      double-buffered VMEM stays well inside the default scoped limit
    """
    half = _round_up(max(1, (m + 1) // 2), SUBLANES)
    tm = max(SUBLANES, min(_TM_MAX, half))
    mp = _round_up(max(m, tm), tm)
    return tm, mp


# ----------------------- fused conv + ReLU + maxpool kernel ----------------------- #

def _conv_pool_kernel(p_ref, w_ref, b_ref, o_ref):
    """p_ref: (4, TM, K) bf16 patch rows, one slab per 2x2 pool-window phase.
    w_ref: (K, 128) bf16.  b_ref: (1, 128) f32.  o_ref: (TM, 128) bf16.

    out = relu(max_phase(patch @ W) + b)   (ReLU and +bias commute with the max).
    Running max keeps at most two live (TM,128) f32 accumulators (v5e-friendly)."""
    w = w_ref[...]
    m = jnp.dot(p_ref[0], w, preferred_element_type=jnp.float32)
    for ph in range(1, 4):
        m = jnp.maximum(m, jnp.dot(p_ref[ph], w, preferred_element_type=jnp.float32))
    o_ref[...] = jnp.maximum(m + b_ref[...], 0.0).astype(o_ref.dtype)


def conv_relu_pool(x, w, b):
    """Conv2d(k=5, stride=1, VALID) + ReLU + MaxPool2d(2,2), NHWC in / NHWC out.

    x: (B, H, W, C), w: (O, C, k, k) torch layout, b: (O,)  ->  (B, PH, PW, O)."""
    B, H, W, C = x.shape
    O, C2, k, _ = w.shape
    assert C == C2
    OH, OW = H - k + 1, W - k + 1
    PH, PW = OH // 2, OW // 2
    K = C * k * k
    Np = LANES

    # im2col patches, NHWC layout.  Feature order of the patch channel is channel-major
    # (c, kh, kw) independent of dimension_numbers, matching torch's weight.reshape(O, C*k*k).
    # (Guarded by the full-model numerical check in __main__.)
    p = lax.conv_general_dilated_patches(
        x.astype(jnp.bfloat16), (k, k), (1, 1), 'VALID',
        dimension_numbers=('NHWC', 'HWIO', 'NHWC'))          # (B, OH, OW, K)

    M = B * PH * PW
    TM, Mp = _pick_tile(M)

    def phase(dh, dw):
        s = p[:, dh::2, dw::2, :][:, :PH, :PW, :].reshape(M, K)
        return jnp.pad(s, ((0, Mp - M), (0, 0)))             # pad rows only; K stays unpadded

    slab = jnp.stack([phase(dh, dw) for dh in (0, 1) for dw in (0, 1)])  # (4, Mp, K) bf16

    w_mat = jnp.pad(w.reshape(O, K).T, ((0, 0), (0, Np - O))).astype(jnp.bfloat16)  # (K, 128)
    b_vec = jnp.pad(b, (0, Np - O)).reshape(1, Np).astype(jnp.float32)

    cost = pl.CostEstimate(
        flops=2 * 4 * Mp * K * Np,
        transcendentals=0,
        bytes_accessed=4 * Mp * K * 2 + K * Np * 2 + Np * 4 + Mp * Np * 2)

    out = pl.pallas_call(
        _conv_pool_kernel,
        out_shape=jax.ShapeDtypeStruct((Mp, Np), jnp.bfloat16),
        grid=(Mp // TM,),
        in_specs=[pl.BlockSpec((4, TM, K), lambda i: (0, i, 0)),
                  pl.BlockSpec((K, Np), lambda i: (0, 0)),
                  pl.BlockSpec((1, Np), lambda i: (0, 0))],
        out_specs=pl.BlockSpec((TM, Np), lambda i: (i, 0)),
        compiler_params=pltpu.CompilerParams(dimension_semantics=("parallel",)),
        cost_estimate=cost,
    )(slab, w_mat, b_vec)

    # Padded rows hold relu(bias) garbage and padded channels are zero; both sliced off.
    return out[:M, :O].reshape(B, PH, PW, O)


# --------------------------- fused fc1 -> fc2 -> fc3 kernel ------------------------ #

def _fc_stack_kernel(x_ref, w1_ref, b1_ref, w2_ref, b2_ref, w3_ref, b3_ref, o_ref):
    h = jnp.dot(x_ref[...], w1_ref[...], preferred_element_type=jnp.float32)
    h = jnp.maximum(h + b1_ref[...], 0.0)
    h = jnp.dot(h.astype(jnp.bfloat16), w2_ref[...], preferred_element_type=jnp.float32)
    h = jnp.maximum(h + b2_ref[...], 0.0)
    h = jnp.dot(h.astype(jnp.bfloat16), w3_ref[...], preferred_element_type=jnp.float32)
    o_ref[...] = h + b3_ref[...]


def fc_stack(x, w1, b1, w2, b2, w3, b3):
    """fc1+ReLU -> fc2+ReLU -> fc3 in one kernel.  x: (B, K) -> (B, 10) f32."""
    B, K = x.shape
    H1, H2, H3 = w1.shape[0], w2.shape[0], w3.shape[0]        # 120, 84, 10
    H1p, H2p, H3p = (_round_up(h, LANES) for h in (H1, H2, H3))
    TM, Mp = _pick_tile(B)

    xp = jnp.pad(x, ((0, Mp - B), (0, 0))).astype(jnp.bfloat16)           # (Mp, K), K unpadded
    w1p = jnp.pad(w1.T, ((0, 0), (0, H1p - H1))).astype(jnp.bfloat16)      # (K, H1p)
    b1p = jnp.pad(b1, (0, H1p - H1)).reshape(1, H1p).astype(jnp.float32)
    w2p = jnp.pad(w2.T, ((0, H1p - H1), (0, H2p - H2))).astype(jnp.bfloat16)
    b2p = jnp.pad(b2, (0, H2p - H2)).reshape(1, H2p).astype(jnp.float32)
    w3p = jnp.pad(w3.T, ((0, H2p - H2), (0, H3p - H3))).astype(jnp.bfloat16)
    b3p = jnp.pad(b3, (0, H3p - H3)).reshape(1, H3p).astype(jnp.float32)

    cost = pl.CostEstimate(
        flops=2 * Mp * (K * H1p + H1p * H2p + H2p * H3p),
        transcendentals=0,
        bytes_accessed=(Mp * K * 2 + (K * H1p + H1p * H2p + H2p * H3p) * 2
                        + (H1p + H2p + H3p) * 4 + Mp * H3p * 4))

    out = pl.pallas_call(
        _fc_stack_kernel,
        out_shape=jax.ShapeDtypeStruct((Mp, H3p), jnp.float32),
        grid=(Mp // TM,),
        in_specs=[pl.BlockSpec((TM, K), lambda i: (i, 0)),
                  pl.BlockSpec((K, H1p), lambda i: (0, 0)),
                  pl.BlockSpec((1, H1p), lambda i: (0, 0)),
                  pl.BlockSpec((H1p, H2p), lambda i: (0, 0)),
                  pl.BlockSpec((1, H2p), lambda i: (0, 0)),
                  pl.BlockSpec((H2p, H3p), lambda i: (0, 0)),
                  pl.BlockSpec((1, H3p), lambda i: (0, 0))],
        out_specs=pl.BlockSpec((TM, H3p), lambda i: (i, 0)),
        compiler_params=pltpu.CompilerParams(dimension_semantics=("parallel",)),
        cost_estimate=cost,
    )(xp, w1p, b1p, w2p, b2p, w3p, b3p)

    return out[:B, :H3]


# ----------------------------------- model ----------------------------------- #

def init_params(key):
    """PyTorch-default-style U(-1/sqrt(fan_in), 1/sqrt(fan_in)) init, torch layouts."""
    def uni(k, shape, fan_in):
        bound = 1.0 / float(fan_in) ** 0.5
        return jax.random.uniform(k, shape, jnp.float32, -bound, bound)

    ks = jax.random.split(key, 10)
    return {
        "conv1_w": uni(ks[0], (6, 3, 5, 5), 3 * 5 * 5),
        "conv1_b": uni(ks[1], (6,), 3 * 5 * 5),
        "conv2_w": uni(ks[2], (16, 6, 5, 5), 6 * 5 * 5),
        "conv2_b": uni(ks[3], (16,), 6 * 5 * 5),
        "fc1_w": uni(ks[4], (120, 400), 400),
        "fc1_b": uni(ks[5], (120,), 400),
        "fc2_w": uni(ks[6], (84, 120), 120),
        "fc2_b": uni(ks[7], (84,), 120),
        "fc3_w": uni(ks[8], (10, 84), 84),
        "fc3_b": uni(ks[9], (10,), 84),
    }


def lenet_forward(params, x):
    """x: (B, 3, 32, 32) NCHW (torch convention) -> (B, 10) f32 logits."""
    x = x.transpose(0, 2, 3, 1)                                   # NCHW -> NHWC once
    x = conv_relu_pool(x, params["conv1_w"], params["conv1_b"])   # (B, 14, 14, 6)
    x = conv_relu_pool(x, params["conv2_w"], params["conv2_b"])   # (B, 5, 5, 16)
    B, PH, PW, O = x.shape
    x = x.reshape(B, PH * PW * O)                                 # NHWC flatten (h, w, c)
    # Fold torch's (c, h, w) view-order into fc1's columns instead of transposing the
    # activation back to NCHW.
    H1 = params["fc1_w"].shape[0]
    w1 = params["fc1_w"].reshape(H1, O, PH, PW).transpose(0, 2, 3, 1).reshape(H1, PH * PW * O)
    return fc_stack(x,
                    w1, params["fc1_b"],
                    params["fc2_w"], params["fc2_b"],
                    params["fc3_w"], params["fc3_b"])             # (B, 10) f32


def lenet_reference(params, x):
    """Pure-JAX f32 reference (matches the PyTorch module) for the numerical self-check."""
    dn = ('NCHW', 'OIHW', 'NCHW')

    def conv_relu(x, w, b):
        y = lax.conv_general_dilated(x, w, (1, 1), 'VALID', dimension_numbers=dn)
        return jnp.maximum(y + b[None, :, None, None], 0.0)

    def pool(x):
        return lax.reduce_window(x, -jnp.inf, lax.max, (1, 1, 2, 2), (1, 1, 2, 2), 'VALID')

    x = pool(conv_relu(x, params["conv1_w"], params["conv1_b"]))
    x = pool(conv_relu(x, params["conv2_w"], params["conv2_b"]))
    x = x.reshape(x.shape[0], -1)
    x = jnp.maximum(x @ params["fc1_w"].T + params["fc1_b"], 0.0)
    x = jnp.maximum(x @ params["fc2_w"].T + params["fc2_b"], 0.0)
    return x @ params["fc3_w"].T + params["fc3_b"]


if __name__ == "__main__":
    key = jax.random.PRNGKey(0)
    pkey, xkey = jax.random.split(key)
    params = init_params(pkey)
    # LeNet's fc1 (400 = 16*5*5) implies a 32x32 RGB input (CIFAR-style), NCHW like torch.
    x = jax.random.normal(xkey, (2, 3, 32, 32), jnp.float32)

    fwd = jax.jit(lenet_forward)
    out = fwd(params, x)
    jax.block_until_ready(out)
    assert out.shape == (2, 10) and out.dtype == jnp.float32

    # Self-check vs. the f32 reference; also guards the patch-feature-order assumption.
    # bf16 MXU operands with f32 accumulation -> loose tolerance (documented precision trade).
    ref = lenet_reference(params, x)
    err = float(jnp.max(jnp.abs(out - ref)))
    assert err < 1e-1, f"Pallas output mismatch vs reference (max abs err {err})"
    print("KERNEL_OK")
</pallas_src>

<mosaic_0001>
module attributes {stable_mosaic.version = 11 : i64} {
  func.func @_conv_pool_kernel(%arg0: i32, %arg1: memref<4x208x75xbf16, #tpu.memory_space<vmem>>, %arg2: memref<75x128xbf16, #tpu.memory_space<vmem>>, %arg3: memref<1x128xf32, #tpu.memory_space<vmem>>, %arg4: memref<208x128xbf16, #tpu.memory_space<vmem>>) attributes {dimension_semantics = [#tpu.dimension_semantics<parallel>], iteration_bounds = array<i64: 2>, scalar_prefetch = 0 : i64, scratch_operands = 0 : i64, tpu.core_type = #tpu.core_type<tc>, window_params = [{transform_indices = @transform_0, window_bounds = array<i64: 4, 208, 75>}, {pipeline_mode = #tpu.pipeline_mode<synchronous>, transform_indices = @transform_1, window_bounds = array<i64: 75, 128>}, {pipeline_mode = #tpu.pipeline_mode<synchronous>, transform_indices = @transform_2, window_bounds = array<i64: 1, 128>}, {transform_indices = @transform_3, window_bounds = array<i64: 208, 128>}]} {
    %c0 = arith.constant 0 : index
    %c0_0 = arith.constant 0 : index
    %0 = vector.load %arg2[%c0, %c0_0] : memref<75x128xbf16, #tpu.memory_space<vmem>>, vector<75x128xbf16>
    %c0_1 = arith.constant 0 : index
    %c0_2 = arith.constant 0 : index
    %c0_3 = arith.constant 0 : index
    %1 = vector.load %arg1[%c0_1, %c0_2, %c0_3] : memref<4x208x75xbf16, #tpu.memory_space<vmem>>, vector<1x208x75xbf16>
    %2 = vector.shape_cast %1 : vector<1x208x75xbf16> to vector<208x75xbf16>
    %cst = arith.constant dense<0.000000e+00> : vector<208x128xf32>
    %3 = tpu.matmul %2, %0, %cst {dimension_numbers = #tpu.dot_dimension_numbers<[1], [0], [0], [1], [0, 0, 1, 1], [], []>} : vector<208x75xbf16>, vector<75x128xbf16>, vector<208x128xf32> -> vector<208x128xf32>
    %c1 = arith.constant 1 : index
    %c0_4 = arith.constant 0 : index
    %c0_5 = arith.constant 0 : index
    %4 = vector.load %arg1[%c1, %c0_4, %c0_5] : memref<4x208x75xbf16, #tpu.memory_space<vmem>>, vector<1x208x75xbf16>
    %5 = vector.shape_cast %4 : vector<1x208x75xbf16> to vector<208x75xbf16>
    %cst_6 = arith.constant dense<0.000000e+00> : vector<208x128xf32>
    %6 = tpu.matmul %5, %0, %cst_6 {dimension_numbers = #tpu.dot_dimension_numbers<[1], [0], [0], [1], [0, 0, 1, 1], [], []>} : vector<208x75xbf16>, vector<75x128xbf16>, vector<208x128xf32> -> vector<208x128xf32>
    %7 = arith.maximumf %3, %6 : vector<208x128xf32>
    %c2 = arith.constant 2 : index
    %c0_7 = arith.constant 0 : index
    %c0_8 = arith.constant 0 : index
    %8 = vector.load %arg1[%c2, %c0_7, %c0_8] : memref<4x208x75xbf16, #tpu.memory_space<vmem>>, vector<1x208x75xbf16>
    %9 = vector.shape_cast %8 : vector<1x208x75xbf16> to vector<208x75xbf16>
    %cst_9 = arith.constant dense<0.000000e+00> : vector<208x128xf32>
    %10 = tpu.matmul %9, %0, %cst_9 {dimension_numbers = #tpu.dot_dimension_numbers<[1], [0], [0], [1], [0, 0, 1, 1], [], []>} : vector<208x75xbf16>, vector<75x128xbf16>, vector<208x128xf32> -> vector<208x128xf32>
    %11 = arith.maximumf %7, %10 : vector<208x128xf32>
    %c3 = arith.constant 3 : index
    %c0_10 = arith.constant 0 : index
    %c0_11 = arith.constant 0 : index
    %12 = vector.load %arg1[%c3, %c0_10, %c0_11] : memref<4x208x75xbf16, #tpu.memory_space<vmem>>, vector<1x208x75xbf16>
    %13 = vector.shape_cast %12 : vector<1x208x75xbf16> to vector<208x75xbf16>
    %cst_12 = arith.constant dense<0.000000e+00> : vector<208x128xf32>
    %14 = tpu.matmul %13, %0, %cst_12 {dimension_numbers = #tpu.dot_dimension_numbers<[1], [0], [0], [1], [0, 0, 1, 1], [], []>} : vector<208x75xbf16>, vector<75x128xbf16>, vector<208x128xf32> -> vector<208x128xf32>
    %15 = arith.maximumf %11, %14 : vector<208x128xf32>
    %c0_13 = arith.constant 0 : index
    %c0_14 = arith.constant 0 : index
    %16 = vector.load %arg3[%c0_13, %c0_14] : memref<1x128xf32, #tpu.memory_space<vmem>>, vector<1x128xf32>
    %17 = vector.broadcast %16 : vector<1x128xf32> to vector<208x128xf32>
    %18 = arith.addf %15, %17 : vector<208x128xf32>
    %cst_15 = arith.constant 0.000000e+00 : f32
    %19 = vector.broadcast %cst_15 : f32 to vector<208x128xf32>
    %20 = arith.maximumf %18, %19 : vector<208x128xf32>
    %21 = arith.truncf %20 : vector<208x128xf32> to vector<208x128xbf16>
    %c0_16 = arith.constant 0 : index
    %c0_17 = arith.constant 0 : index
    %22 = vector.load %arg4[%c0_16, %c0_17] : memref<208x128xbf16, #tpu.memory_space<vmem>>, vector<208x128xbf16>
    tpu.vector_store %arg4[%c0_16, %c0_17], %21 {strides = array<i32>} : memref<208x128xbf16, #tpu.memory_space<vmem>>, vector<208x128xbf16>,
    return
  }
  func.func @transform_0(%arg0: i32) -> (i32, i32, i32) {
    %c0_i32 = arith.constant 0 : i32
    %c0_i32_0 = arith.constant 0 : i32
    %c0_i32_1 = arith.constant 0 : i32
    return %c0_i32, %arg0, %c0_i32_0 : i32, i32, i32
  }
  func.func @transform_1(%arg0: i32) -> (i32, i32) {
    %c0_i32 = arith.constant 0 : i32
    %c0_i32_0 = arith.constant 0 : i32
    %c0_i32_1 = arith.constant 0 : i32
    return %c0_i32, %c0_i32_0 : i32, i32
  }
  func.func @transform_2(%arg0: i32) -> (i32, i32) {
    %c0_i32 = arith.constant 0 : i32
    %c0_i32_0 = arith.constant 0 : i32
    %c0_i32_1 = arith.constant 0 : i32
    return %c0_i32, %c0_i32_0 : i32, i32
  }
  func.func @transform_3(%arg0: i32) -> (i32, i32) {
    %c0_i32 = arith.constant 0 : i32
    %c0_i32_0 = arith.constant 0 : i32
    return %arg0, %c0_i32 : i32, i32
  }
}

module attributes {stable_mosaic.version = 11 : i64} {
  func.func @_conv_pool_kernel(%arg0: i32, %arg1: memref<4x32x150xbf16, #tpu.memory_space<vmem>>, %arg2: memref<150x128xbf16, #tpu.memory_space<vmem>>, %arg3: memref<1x128xf32, #tpu.memory_space<vmem>>, %arg4: memref<32x128xbf16, #tpu.memory_space<vmem>>) attributes {dimension_semantics = [#tpu.dimension_semantics<parallel>], iteration_bounds = array<i64: 2>, scalar_prefetch = 0 : i64, scratch_operands = 0 : i64, tpu.core_type = #tpu.core_type<tc>, window_params = [{transform_indices = @transform_0, window_bounds = array<i64: 4, 32, 150>}, {pipeline_mode = #tpu.pipeline_mode<synchronous>, transform_indices = @transform_1, window_bounds = array<i64: 150, 128>}, {pipeline_mode = #tpu.pipeline_mode<synchronous>, transform_indices = @transform_2, window_bounds = array<i64: 1, 128>}, {transform_indices = @transform_3, window_bounds = array<i64: 32, 128>}]} {
    %c0 = arith.constant 0 : index
    %c0_0 = arith.constant 0 : index
    %0 = vector.load %arg2[%c0, %c0_0] : memref<150x128xbf16, #tpu.memory_space<vmem>>, vector<150x128xbf16>
    %c0_1 = arith.constant 0 : index
    %c0_2 = arith.constant 0 : index
    %c0_3 = arith.constant 0 : index
    %1 = vector.load %arg1[%c0_1, %c0_2, %c0_3] : memref<4x32x150xbf16, #tpu.memory_space<vmem>>, vector<1x32x150xbf16>
    %2 = vector.shape_cast %1 : vector<1x32x150xbf16> to vector<32x150xbf16>
    %cst = arith.constant dense<0.000000e+00> : vector<32x128xf32>
    %3 = tpu.matmul %2, %0, %cst {dimension_numbers = #tpu.dot_dimension_numbers<[1], [0], [0], [1], [0, 0, 1, 1], [], []>} : vector<32x150xbf16>, vector<150x128xbf16>, vector<32x128xf32> -> vector<32x128xf32>
    %c1 = arith.constant 1 : index
    %c0_4 = arith.constant 0 : index
    %c0_5 = arith.constant 0 : index
    %4 = vector.load %arg1[%c1, %c0_4, %c0_5] : memref<4x32x150xbf16, #tpu.memory_space<vmem>>, vector<1x32x150xbf16>
    %5 = vector.shape_cast %4 : vector<1x32x150xbf16> to vector<32x150xbf16>
    %cst_6 = arith.constant dense<0.000000e+00> : vector<32x128xf32>
    %6 = tpu.matmul %5, %0, %cst_6 {dimension_numbers = #tpu.dot_dimension_numbers<[1], [0], [0], [1], [0, 0, 1, 1], [], []>} : vector<32x150xbf16>, vector<150x128xbf16>, vector<32x128xf32> -> vector<32x128xf32>
    %7 = arith.maximumf %3, %6 : vector<32x128xf32>
    %c2 = arith.constant 2 : index
    %c0_7 = arith.constant 0 : index
    %c0_8 = arith.constant 0 : index
    %8 = vector.load %arg1[%c2, %c0_7, %c0_8] : memref<4x32x150xbf16, #tpu.memory_space<vmem>>, vector<1x32x150xbf16>
    %9 = vector.shape_cast %8 : vector<1x32x150xbf16> to vector<32x150xbf16>
    %cst_9 = arith.constant dense<0.000000e+00> : vector<32x128xf32>
    %10 = tpu.matmul %9, %0, %cst_9 {dimension_numbers = #tpu.dot_dimension_numbers<[1], [0], [0], [1], [0, 0, 1, 1], [], []>} : vector<32x150xbf16>, vector<150x128xbf16>, vector<32x128xf32> -> vector<32x128xf32>
    %11 = arith.maximumf %7, %10 : vector<32x128xf32>
    %c3 = arith.constant 3 : index
    %c0_10 = arith.constant 0 : index
    %c0_11 = arith.constant 0 : index
    %12 = vector.load %arg1[%c3, %c0_10, %c0_11] : memref<4x32x150xbf16, #tpu.memory_space<vmem>>, vector<1x32x150xbf16>
    %13 = vector.shape_cast %12 : vector<1x32x150xbf16> to vector<32x150xbf16>
    %cst_12 = arith.constant dense<0.000000e+00> : vector<32x128xf32>
    %14 = tpu.matmul %13, %0, %cst_12 {dimension_numbers = #tpu.dot_dimension_numbers<[1], [0], [0], [1], [0, 0, 1, 1], [], []>} : vector<32x150xbf16>, vector<150x128xbf16>, vector<32x128xf32> -> vector<32x128xf32>
    %15 = arith.maximumf %11, %14 : vector<32x128xf32>
    %c0_13 = arith.constant 0 : index
    %c0_14 = arith.constant 0 : index
    %16 = vector.load %arg3[%c0_13, %c0_14] : memref<1x128xf32, #tpu.memory_space<vmem>>, vector<1x128xf32>
    %17 = vector.broadcast %16 : vector<1x128xf32> to vector<32x128xf32>
    %18 = arith.addf %15, %17 : vector<32x128xf32>
    %cst_15 = arith.constant 0.000000e+00 : f32
    %19 = vector.broadcast %cst_15 : f32 to vector<32x128xf32>
    %20 = arith.maximumf %18, %19 : vector<32x128xf32>
    %21 = arith.truncf %20 : vector<32x128xf32> to vector<32x128xbf16>
    %c0_16 = arith.constant 0 : index
    %c0_17 = arith.constant 0 : index
    %22 = vector.load %arg4[%c0_16, %c0_17] : memref<32x128xbf16, #tpu.memory_space<vmem>>, vector<32x128xbf16>
    tpu.vector_store %arg4[%c0_16, %c0_17], %21 {strides = array<i32>} : memref<32x128xbf16, #tpu.memory_space<vmem>>, vector<32x128xbf16>,
    return
  }
  func.func @transform_0(%arg0: i32) -> (i32, i32, i32) {
    %c0_i32 = arith.constant 0 : i32
    %c0_i32_0 = arith.constant 0 : i32
    %c0_i32_1 = arith.constant 0 : i32
    return %c0_i32, %arg0, %c0_i32_0 : i32, i32, i32
  }
  func.func @transform_1(%arg0: i32) -> (i32, i32) {
    %c0_i32 = arith.constant 0 : i32
    %c0_i32_0 = arith.constant 0 : i32
    %c0_i32_1 = arith.constant 0 : i32
    return %c0_i32, %c0_i32_0 : i32, i32
  }
  func.func @transform_2(%arg0: i32) -> (i32, i32) {
    %c0_i32 = arith.constant 0 : i32
    %c0_i32_0 = arith.constant 0 : i32
    %c0_i32_1 = arith.constant 0 : i32
    return %c0_i32, %c0_i32_0 : i32, i32
  }
  func.func @transform_3(%arg0: i32) -> (i32, i32) {
    %c0_i32 = arith.constant 0 : i32
    %c0_i32_0 = arith.constant 0 : i32
    return %arg0, %c0_i32 : i32, i32
  }
}

module attributes {stable_mosaic.version = 11 : i64} {
  func.func @_fc_stack_kernel(%arg0: i32, %arg1: memref<16x400xbf16, #tpu.memory_space<vmem>>, %arg2: memref<400x128xbf16, #tpu.memory_space<vmem>>, %arg3: memref<1x128xf32, #tpu.memory_space<vmem>>, %arg4: memref<128x128xbf16, #tpu.memory_space<vmem>>, %arg5: memref<1x128xf32, #tpu.memory_space<vmem>>, %arg6: memref<128x128xbf16, #tpu.memory_space<vmem>>, %arg7: memref<1x128xf32, #tpu.memory_space<vmem>>, %arg8: memref<16x128xf32, #tpu.memory_space<vmem>>) attributes {dimension_semantics = [#tpu.dimension_semantics<parallel>], iteration_bounds = array<i64: 1>, scalar_prefetch = 0 : i64, scratch_operands = 0 : i64, tpu.core_type = #tpu.core_type<tc>, window_params = [{transform_indices = @transform_0, window_bounds = array<i64: 16, 400>}, {pipeline_mode = #tpu.pipeline_mode<synchronous>, transform_indices = @transform_1, window_bounds = array<i64: 400, 128>}, {pipeline_mode = #tpu.pipeline_mode<synchronous>, transform_indices = @transform_2, window_bounds = array<i64: 1, 128>}, {pipeline_mode = #tpu.pipeline_mode<synchronous>, transform_indices = @transform_3, window_bounds = array<i64: 128, 128>}, {pipeline_mode = #tpu.pipeline_mode<synchronous>, transform_indices = @transform_4, window_bounds = array<i64: 1, 128>}, {pipeline_mode = #tpu.pipeline_mode<synchronous>, transform_indices = @transform_5, window_bounds = array<i64: 128, 128>}, {pipeline_mode = #tpu.pipeline_mode<synchronous>, transform_indices = @transform_6, window_bounds = array<i64: 1, 128>}, {transform_indices = @transform_7, window_bounds = array<i64: 16, 128>}]} {
    %c0 = arith.constant 0 : index
    %c0_0 = arith.constant 0 : index
    %0 = vector.load %arg1[%c0, %c0_0] : memref<16x400xbf16, #tpu.memory_space<vmem>>, vector<16x400xbf16>
    %c0_1 = arith.constant 0 : index
    %c0_2 = arith.constant 0 : index
    %1 = vector.load %arg2[%c0_1, %c0_2] : memref<400x128xbf16, #tpu.memory_space<vmem>>, vector<400x128xbf16>
    %cst = arith.constant dense<0.000000e+00> : vector<16x128xf32>
    %2 = tpu.matmul %0, %1, %cst {dimension_numbers = #tpu.dot_dimension_numbers<[1], [0], [0], [1], [0, 0, 1, 1], [], []>} : vector<16x400xbf16>, vector<400x128xbf16>, vector<16x128xf32> -> vector<16x128xf32>
    %c0_3 = arith.constant 0 : index
    %c0_4 = arith.constant 0 : index
    %3 = vector.load %arg3[%c0_3, %c0_4] : memref<1x128xf32, #tpu.memory_space<vmem>>, vector<1x128xf32>
    %4 = vector.broadcast %3 : vector<1x128xf32> to vector<16x128xf32>
    %5 = arith.addf %2, %4 : vector<16x128xf32>
    %cst_5 = arith.constant 0.000000e+00 : f32
    %6 = vector.broadcast %cst_5 : f32 to vector<16x128xf32>
    %7 = arith.maximumf %5, %6 : vector<16x128xf32>
    %8 = arith.truncf %7 : vector<16x128xf32> to vector<16x128xbf16>
    %c0_6 = arith.constant 0 : index
    %c0_7 = arith.constant 0 : index
    %9 = vector.load %arg4[%c0_6, %c0_7] : memref<128x128xbf16, #tpu.memory_space<vmem>>, vector<128x128xbf16>
    %cst_8 = arith.constant dense<0.000000e+00> : vector<16x128xf32>
    %10 = tpu.matmul %8, %9, %cst_8 {dimension_numbers = #tpu.dot_dimension_numbers<[1], [0], [0], [1], [0, 0, 1, 1], [], []>} : vector<16x128xbf16>, vector<128x128xbf16>, vector<16x128xf32> -> vector<16x128xf32>
    %c0_9 = arith.constant 0 : index
    %c0_10 = arith.constant 0 : index
    %11 = vector.load %arg5[%c0_9, %c0_10] : memref<1x128xf32, #tpu.memory_space<vmem>>, vector<1x128xf32>
    %12 = vector.broadcast %11 : vector<1x128xf32> to vector<16x128xf32>
    %13 = arith.addf %10, %12 : vector<16x128xf32>
    %cst_11 = arith.constant 0.000000e+00 : f32
    %14 = vector.broadcast %cst_11 : f32 to vector<16x128xf32>
    %15 = arith.maximumf %13, %14 : vector<16x128xf32>
    %16 = arith.truncf %15 : vector<16x128xf32> to vector<16x128xbf16>
    %c0_12 = arith.constant 0 : index
    %c0_13 = arith.constant 0 : index
    %17 = vector.load %arg6[%c0_12, %c0_13] : memref<128x128xbf16, #tpu.memory_space<vmem>>, vector<128x128xbf16>
    %cst_14 = arith.constant dense<0.000000e+00> : vector<16x128xf32>
    %18 = tpu.matmul %16, %17, %cst_14 {dimension_numbers = #tpu.dot_dimension_numbers<[1], [0], [0], [1], [0, 0, 1, 1], [], []>} : vector<16x128xbf16>, vector<128x128xbf16>, vector<16x128xf32> -> vector<16x128xf32>
    %c0_15 = arith.constant 0 : index
    %c0_16 = arith.constant 0 : index
    %19 = vector.load %arg7[%c0_15, %c0_16] : memref<1x128xf32, #tpu.memory_space<vmem>>, vector<1x128xf32>
    %20 = vector.broadcast %19 : vector<1x128xf32> to vector<16x128xf32>
    %21 = arith.addf %18, %20 : vector<16x128xf32>
    %c0_17 = arith.constant 0 : index
    %c0_18 = arith.constant 0 : index
    %22 = vector.load %arg8[%c0_17, %c0_18] : memref<16x128xf32, #tpu.memory_space<vmem>>, vector<16x128xf32>
    tpu.vector_store %arg8[%c0_17, %c0_18], %21 {strides = array<i32>} : memref<16x128xf32, #tpu.memory_space<vmem>>, vector<16x128xf32>,
    return
  }
  func.func @transform_0(%arg0: i32) -> (i32, i32) {
    %c0_i32 = arith.constant 0 : i32
    %c0_i32_0 = arith.constant 0 : i32
    return %arg0, %c0_i32 : i32, i32
  }
  func.func @transform_1(%arg0: i32) -> (i32, i32) {
    %c0_i32 = arith.constant 0 : i32
    %c0_i32_0 = arith.constant 0 : i32
    %c0_i32_1 = arith.constant 0 : i32
    return %c0_i32, %c0_i32_0 : i32, i32
  }
  func.func @transform_2(%arg0: i32) -> (i32, i32) {
    %c0_i32 = arith.constant 0 : i32
    %c0_i32_0 = arith.constant 0 : i32
    %c0_i32_1 = arith.constant 0 : i32
    return %c0_i32, %c0_i32_0 : i32, i32
  }
  func.func @transform_3(%arg0: i32) -> (i32, i32) {
    %c0_i32 = arith.constant 0 : i32
    %c0_i32_0 = arith.constant 0 : i32
    %c0_i32_1 = arith.constant 0 : i32
    return %c0_i32, %c0_i32_0 : i32, i32
  }
  func.func @transform_4(%arg0: i32) -> (i32, i32) {
    %c0_i32 = arith.constant 0 : i32
    %c0_i32_0 = arith.constant 0 : i32
    %c0_i32_1 = arith.constant 0 : i32
    return %c0_i32, %c0_i32_0 : i32, i32
  }
  func.func @transform_5(%arg0: i32) -> (i32, i32) {
    %c0_i32 = arith.constant 0 : i32
    %c0_i32_0 = arith.constant 0 : i32
    %c0_i32_1 = arith.constant 0 : i32
    return %c0_i32, %c0_i32_0 : i32, i32
  }
  func.func @transform_6(%arg0: i32) -> (i32, i32) {
    %c0_i32 = arith.constant 0 : i32
    %c0_i32_0 = arith.constant 0 : i32
    %c0_i32_1 = arith.constant 0 : i32
    return %c0_i32, %c0_i32_0 : i32, i32
  }
  func.func @transform_7(%arg0: i32) -> (i32, i32) {
    %c0_i32 = arith.constant 0 : i32
    %c0_i32_0 = arith.constant 0 : i32
    return %arg0, %c0_i32 : i32, i32
  }
}

</mosaic_0001>

<bundles_post_ra>
// kernel: lenet_forward.3
= control target key start
LH: loop header
LB: loop body
LE: loop exit
PB: predicated region body
PF: predicated region fallthrough
CT: control target
= control target key end

     0   :  { %s2857_s12 = smov 0   ;;  %s2859_s13 = smov 0   ;;  %s3542_s0 = inlined_call_operand.vmem [shape: bf16[4,416,75], index: 0, kind: input, shape index: {}]   ;;  %s3543_s1 = inlined_call_operand.vmem [shape: bf16[75,128], index: 1, kind: input, shape index: {}]   ;;  %s3544_s2 = inlined_call_operand.vmem [shape: f32[1,128], index: 2, kind: input, shape index: {}]   ;;  %s3545_s3 = inlined_call_operand.vmem [shape: bf16[416,128], index: 3, kind: output, shape index: {}]  }
   0x1   :  { %s2861_s14 = smov 0  }
   0x2 LB: > { %s2077_s15 = sadd.s32 4294967295, %s2832_s14   ;;  %s2874_s16 = sadd.s32 1, %s2832_s14   ;;  %s2832_s14 = sphi %s2861_s14, %s3585_s14   ;;  %s2828_s13 = sphi %s2859_s13, %s3584_s13   ;;  %s2824_s12 = sphi %s2857_s12, %s3583_s12  }
   0x3   : > { %s17_s17 = ssub.s32 %s2832_s14, %s2874_s16  ;;  %s20_s18 = sadd.s32 1, %s2828_s13 }
   0x4   : > { %p18_p0 = scmp.eq.s32.totalorder %s17_s17, 0  ;;  %p27_p1 = scmp.ne.s32.totalorder %s2828_s13, %s2824_s12 }
   0x5   : > { %p28_p2 = scmp.eq.s32.totalorder %s2832_s14, 0  ;;  %p2080_p4 = scmp.ge.s32.totalorder %s2832_s14, 2 }
   0x6   : > { %s2883_s19 = scalar_select %p18_p0, %s2828_s13, %s20_s18  }
   0x7   : > { %p29_p3 = por %p28_p2, %p27_p1  ;;  %127 = sbr.rel (%p2080_p4) target bundleno = 43 (0x2b), region = 24 }
   0xc   : > { %130 = sbr.rel (!%p29_p3) target bundleno = 43 (0x2b), region = 28  ;;  %s132_s20 = sand.u32 (%p29_p3), 1, %s2828_s13  }
   0xd   : > { %s2300_s21 = smul.u32 (%p29_p3), 104, %s2832_s14 }
   0xe   : > { %s2724_s22 = smul.u32 (%p29_p3), 416, %s132_s20 }
   0xf   : > { %s2891_s25 = scalar_lea.vmem (%p29_p3), %s3542_s0, %s2300_s21 }
  0x10   : > { %v154_v0 = vld [vmem:[%s2891_s25] sm:$0xff] (%p29_p3)   ;;  %v158_v1 = vld [vmem:[%s2891_s25 + $0x8] sm:$0xff] (%p29_p3)   ;;  %v162_v2 = vld [vmem:[%s2891_s25 + $0x10] sm:$0xff] (%p29_p3)   ;;  %s2896_s26 = scalar_lea.vmem (%p29_p3), [#allocation2], %s2724_s22 }
  0x11   : > { %155 = vst [vmem:[%s2896_s26] sm:$0xff] %v154_v0   ;;  %159 = vst [vmem:[%s2896_s26 + $0x8] sm:$0xff] %v158_v1   ;;  %v166_v3 = vld [vmem:[%s2891_s25 + $0x18] sm:$0xff]   ;;  %v170_v4 = vld [vmem:[%s2891_s25 + $0x20] sm:$0xff]  }
  0x12   : > { %163 = vst [vmem:[%s2896_s26 + $0x10] sm:$0xff] %v162_v2   ;;  %v174_v5 = vld [vmem:[%s2891_s25 + $0x28] sm:$0xff]   ;;  %167 = vst [vmem:[%s2896_s26 + $0x18] sm:$0xff] %v166_v3   ;;  %v178_v6 = vld [vmem:[%s2891_s25 + $0x30] sm:$0xff]  }
  0x13   : > { %171 = vst [vmem:[%s2896_s26 + $0x20] sm:$0xff] %v170_v4   ;;  %175 = vst [vmem:[%s2896_s26 + $0x28] sm:$0xff] %v174_v5   ;;  %v182_v7 = vld [vmem:[%s2891_s25 + $0x38] sm:$0xff]   ;;  %v186_v8 = vld [vmem:[%s2891_s25 + $0x40] sm:$0xff]  }
  0x14   : > { %179 = vst [vmem:[%s2896_s26 + $0x30] sm:$0xff] %v178_v6   ;;  %183 = vst [vmem:[%s2896_s26 + $0x38] sm:$0xff] %v182_v7   ;;  %v190_v9 = vld [vmem:[%s2891_s25 + $0x48] sm:$0xff]   ;;  %v194_v10 = vld [vmem:[%s2891_s25 + $0x50] sm:$0xff]  }
  0x15   : > { %187 = vst [vmem:[%s2896_s26 + $0x40] sm:$0xff] %v186_v8   ;;  %v198_v11 = vld [vmem:[%s2891_s25 + $0x58] sm:$0xff]   ;;  %191 = vst [vmem:[%s2896_s26 + $0x48] sm:$0xff] %v190_v9   ;;  %v202_v12 = vld [vmem:[%s2891_s25 + $0x60] sm:$0xff]  }
  0x16   : > { %195 = vst [vmem:[%s2896_s26 + $0x50] sm:$0xff] %v194_v10   ;;  %199 = vst [vmem:[%s2896_s26 + $0x58] sm:$0xff] %v198_v11   ;;  %v206_v13 = vld [vmem:[%s2891_s25 + $0xd0] sm:$0xff]   ;;  %v210_v14 = vld [vmem:[%s2891_s25 + $0xd8] sm:$0xff]  }
  0x17   : > { %203 = vst [vmem:[%s2896_s26 + $0x60] sm:$0xff] %v202_v12   ;;  %207 = vst [vmem:[%s2896_s26 + $0x68] sm:$0xff] %v206_v13   ;;  %v214_v15 = vld [vmem:[%s2891_s25 + $0xe0] sm:$0xff]   ;;  %v218_v16 = vld [vmem:[%s2891_s25 + $0xe8] sm:$0xff]  }
  0x18   : > { %211 = vst [vmem:[%s2896_s26 + $0x70] sm:$0xff] %v210_v14   ;;  %v222_v17 = vld [vmem:[%s2891_s25 + $0xf0] sm:$0xff]   ;;  %215 = vst [vmem:[%s2896_s26 + $0x78] sm:$0xff] %v214_v15   ;;  %v226_v18 = vld [vmem:[%s2891_s25 + $0xf8] sm:$0xff]  }
  0x19   : > { %219 = vst [vmem:[%s2896_s26 + $0x80] sm:$0xff] %v218_v16   ;;  %223 = vst [vmem:[%s2896_s26 + $0x88] sm:$0xff] %v222_v17   ;;  %v230_v19 = vld [vmem:[%s2891_s25 + $0x100] sm:$0xff]   ;;  %v234_v20 = vld [vmem:[%s2891_s25 + $0x108] sm:$0xff]  }
  0x1a   : > { %227 = vst [vmem:[%s2896_s26 + $0x90] sm:$0xff] %v226_v18   ;;  %231 = vst [vmem:[%s2896_s26 + $0x98] sm:$0xff] %v230_v19   ;;  %v238_v21 = vld [vmem:[%s2891_s25 + $0x110] sm:$0xff]   ;;  %v242_v22 = vld [vmem:[%s2891_s25 + $0x118] sm:$0xff]  }
  0x1b   : > { %235 = vst [vmem:[%s2896_s26 + $0xa0] sm:$0xff] %v234_v20   ;;  %v246_v23 = vld [vmem:[%s2891_s25 + $0x120] sm:$0xff]   ;;  %239 = vst [vmem:[%s2896_s26 + $0xa8] sm:$0xff] %v238_v21   ;;  %v250_v24 = vld [vmem:[%s2891_s25 + $0x128] sm:$0xff]  }
  0x1c   : > { %243 = vst [vmem:[%s2896_s26 + $0xb0] sm:$0xff] %v242_v22   ;;  %247 = vst [vmem:[%s2896_s26 + $0xb8] sm:$0xff] %v246_v23   ;;  %v254_v25 = vld [vmem:[%s2891_s25 + $0x130] sm:$0xff]   ;;  %v258_v26 = vld [vmem:[%s2891_s25 + $0x1a0] sm:$0xff]  }
  0x1d   : > { %251 = vst [vmem:[%s2896_s26 + $0xc0] sm:$0xff] %v250_v24   ;;  %255 = vst [vmem:[%s2896_s26 + $0xc8] sm:$0xff] %v254_v25   ;;  %v262_v27 = vld [vmem:[%s2891_s25 + $0x1a8] sm:$0xff]   ;;  %v266_v28 = vld [vmem:[%s2891_s25 + $0x1b0] sm:$0xff]  }
  0x1e   : > { %259 = vst [vmem:[%s2896_s26 + $0xd0] sm:$0xff] %v258_v26   ;;  %v270_v29 = vld [vmem:[%s2891_s25 + $0x1b8] sm:$0xff]   ;;  %263 = vst [vmem:[%s2896_s26 + $0xd8] sm:$0xff] %v262_v27   ;;  %v274_v30 = vld [vmem:[%s2891_s25 + $0x1c0] sm:$0xff]  }
  0x1f   : > { %267 = vst [vmem:[%s2896_s26 + $0xe0] sm:$0xff] %v266_v28   ;;  %271 = vst [vmem:[%s2896_s26 + $0xe8] sm:$0xff] %v270_v29   ;;  %v278_v31 = vld [vmem:[%s2891_s25 + $0x1c8] sm:$0xff]   ;;  %v282_v32 = vld [vmem:[%s2891_s25 + $0x1d0] sm:$0xff]  }
  0x20   : > { %275 = vst [vmem:[%s2896_s26 + $0xf0] sm:$0xff] %v274_v30   ;;  %279 = vst [vmem:[%s2896_s26 + $0xf8] sm:$0xff] %v278_v31   ;;  %v286_v33 = vld [vmem:[%s2891_s25 + $0x1d8] sm:$0xff]   ;;  %v290_v34 = vld [vmem:[%s2891_s25 + $0x1e0] sm:$0xff]  }
  0x21   : > { %283 = vst [vmem:[%s2896_s26 + $0x100] sm:$0xff] %v282_v32   ;;  %v294_v35 = vld [vmem:[%s2891_s25 + $0x1e8] sm:$0xff]   ;;  %287 = vst [vmem:[%s2896_s26 + $0x108] sm:$0xff] %v286_v33   ;;  %v298_v36 = vld [vmem:[%s2891_s25 + $0x1f0] sm:$0xff]  }
  0x22   : > { %291 = vst [vmem:[%s2896_s26 + $0x110] sm:$0xff] %v290_v34   ;;  %295 = vst [vmem:[%s2896_s26 + $0x118] sm:$0xff] %v294_v35   ;;  %v302_v37 = vld [vmem:[%s2891_s25 + $0x1f8] sm:$0xff]   ;;  %v306_v38 = vld [vmem:[%s2891_s25 + $0x200] sm:$0xff]  }
  0x23   : > { %299 = vst [vmem:[%s2896_s26 + $0x120] sm:$0xff] %v298_v36   ;;  %303 = vst [vmem:[%s2896_s26 + $0x128] sm:$0xff] %v302_v37   ;;  %v310_v39 = vld [vmem:[%s2891_s25 + $0x270] sm:$0xff]   ;;  %v314_v40 = vld [vmem:[%s2891_s25 + $0x278] sm:$0xff]  }
  0x24   : > { %307 = vst [vmem:[%s2896_s26 + $0x130] sm:$0xff] %v306_v38   ;;  %v318_v41 = vld [vmem:[%s2891_s25 + $0x280] sm:$0xff]   ;;  %311 = vst [vmem:[%s2896_s26 + $0x138] sm:$0xff] %v310_v39   ;;  %v322_v42 = vld [vmem:[%s2891_s25 + $0x288] sm:$0xff]  }
  0x25   : > { %315 = vst [vmem:[%s2896_s26 + $0x140] sm:$0xff] %v314_v40   ;;  %319 = vst [vmem:[%s2896_s26 + $0x148] sm:$0xff] %v318_v41   ;;  %v326_v43 = vld [vmem:[%s2891_s25 + $0x290] sm:$0xff]   ;;  %v330_v44 = vld [vmem:[%s2891_s25 + $0x298] sm:$0xff]  }
  0x26   : > { %323 = vst [vmem:[%s2896_s26 + $0x150] sm:$0xff] %v322_v42   ;;  %327 = vst [vmem:[%s2896_s26 + $0x158] sm:$0xff] %v326_v43   ;;  %v334_v45 = vld [vmem:[%s2891_s25 + $0x2a0] sm:$0xff]   ;;  %v338_v46 = vld [vmem:[%s2891_s25 + $0x2a8] sm:$0xff]  }
  0x27   : > { %331 = vst [vmem:[%s2896_s26 + $0x160] sm:$0xff] %v330_v44   ;;  %v342_v47 = vld [vmem:[%s2891_s25 + $0x2b0] sm:$0xff]   ;;  %335 = vst [vmem:[%s2896_s26 + $0x168] sm:$0xff] %v334_v45   ;;  %v346_v48 = vld [vmem:[%s2891_s25 + $0x2b8] sm:$0xff]  }
  0x28   : > { %339 = vst [vmem:[%s2896_s26 + $0x170] sm:$0xff] %v338_v46   ;;  %343 = vst [vmem:[%s2896_s26 + $0x178] sm:$0xff] %v342_v47   ;;  %v350_v49 = vld [vmem:[%s2891_s25 + $0x2c0] sm:$0xff]   ;;  %v354_v50 = vld [vmem:[%s2891_s25 + $0x2c8] sm:$0xff]  }
  0x29   : > { %347 = vst [vmem:[%s2896_s26 + $0x180] sm:$0xff] %v346_v48   ;;  %351 = vst [vmem:[%s2896_s26 + $0x188] sm:$0xff] %v350_v49   ;;  %v358_v51 = vld [vmem:[%s2891_s25 + $0x2d0] sm:$0xff]  }
  0x2a   : > { %355 = vst [vmem:[%s2896_s26 + $0x190] sm:$0xff] %v354_v50   ;;  %359 = vst [vmem:[%s2896_s26 + $0x198] sm:$0xff] %v358_v51  }
  0x2b PF: > { %p2082_p5 = scmp.ge.s32.totalorder %s2832_s14, 1  ;;  %p592_p6 = scmp.lt.s32.totalorder %s2832_s14, 3 }
  0x2d   : > { %p593_p7 = pnand %p2082_p5, %p592_p6 }
  0x2f   : > { %596 = sbr.rel (%p593_p7) target bundleno = 484 (0x1e4), region = 69 }
  0x34   : > { %vm800_vm0 = vcmask 1044480   ;;  %v2834_v52 = vmov 0.0   ;;  %v2753_v53 = vld [vmem:[%s3543_s1 + $0x20] sm:$0x3f]   ;;  %vm801_vm1 = vcmask 1045504   ;;  %v2835_v54 = vmov 65535  }
  0x35   : > { %2476 = vmatprep.subr.bf16.mxu0 %v2834_v52  ;;  %2538 = vmatprep.subr.bf16.mxu1 %v2834_v52  ;;  %v802_v55 = vsel %vm800_vm0, 4294967295, %v2835_v54  ;;  %vm2836_vm2 = vmmov 0   ;;  %s599_s29 = sand.u32 1, %s2824_s12   ;;  %v2754_v58 = vld [vmem:[%s3543_s1 + $0x18] sm:$0xff]   ;;  %v2755_v59 = vld [vmem:[%s3543_s1 + $0x10] sm:$0xff]   ;;  %v2756_v60 = vld [vmem:[%s3543_s1 + $0x8] sm:$0xff]  }
  0x36   : > { %v803_v56 = vsel %vm801_vm1, %v802_v55, 0  ;;  %2486 = vmatprep.mubr.msk.bf16.mxu0 %vm2836_vm2, %v2834_v52  ;;  %2548 = vmatprep.mubr.msk.bf16.mxu1 %vm2836_vm2, %v2834_v52  ;;  %s2725_s5 = smul.u32 416, %s599_s29  ;;  %v2757_v61 = vld [vmem:[%s3543_s1] sm:$0xff]   ;;  %vm760_vm3 = vcmask 613376  }
  0x37   : > { %v805_v57 = vand.u32 %v2753_v53, %v803_v56  ;;  %s623_s17 = smul.u32 26, %s2077_s15 }
  0x38   : > { %s3016_s6 = scalar_lea.vmem [#allocation2], %s2725_s5 }
  0x39   : > { %2477 = vmatpush3.bf16.msra.mxu0 %v805_v57  ;;  %2539 = vmatpush3.bf16.msra.mxu1 %v805_v57  ;;  %v2758_v62 = vld [vmem:[%s3016_s6] sm:$0xff]   ;;  %v2759_v63 = vld [vmem:[%s3016_s6 + $0x68] sm:$0xff]   ;;  %v2761_v1 = vld [vmem:[%s3016_s6 + $0x70] sm:$0xff]   ;;  %p624_p8 = scmp.lt.s32.totalorder %s623_s17, 51 }
  0x3a   : > { %2478 = vmatprep.subr.bf16.mxu0 %v2834_v52  ;;  %2540 = vmatprep.subr.bf16.mxu1 %v2834_v52  ;;  %v2760_v0 = vld [vmem:[%s3016_s6 + $0x8] sm:$0xff]   ;;  %v2762_v2 = vld [vmem:[%s3016_s6 + $0x10] sm:$0xff]   ;;  %v2763_v3 = vld [vmem:[%s3016_s6 + $0x78] sm:$0xff]  }
  0x3b   : > { %v2764_v4 = vld [vmem:[%s3016_s6 + $0x18] sm:$0xff]   ;;  %v2765_v5 = vld [vmem:[%s3016_s6 + $0x80] sm:$0xff]   ;;  %v2767_v7 = vld [vmem:[%s3016_s6 + $0x88] sm:$0xff]   ;;  %s3587_s17 = smov (!%p624_p8, %s623_s17), 51 }
  0x3c   : > { %v2766_v6 = vld [vmem:[%s3016_s6 + $0x20] sm:$0xff]   ;;  %v2768_v8 = vld [vmem:[%s3016_s6 + $0x28] sm:$0xff]   ;;  %v2769_v9 = vld [vmem:[%s3016_s6 + $0x90] sm:$0xff]   ;;  %s2083_s14 = sshll.u32 %s3587_s17, 2 }
  0x3d   : > { %2479 = vmatpush3.bf16.msra.mxu0 %v2754_v58  ;;  %2541 = vmatpush3.bf16.msra.mxu1 %v2754_v58  ;;  %v2770_v10 = vld [vmem:[%s3016_s6 + $0x30] sm:$0xff]   ;;  %v2771_v11 = vld [vmem:[%s3016_s6 + $0x98] sm:$0xff]   ;;  %v2773_v13 = vld [vmem:[%s3016_s6 + $0xa0] sm:$0xff]   ;;  %s3424_s22 = scalar_lea.vmem %s3545_s3, %s2083_s14 }
  0x3e   : > { %2480 = vmatprep.subr.bf16.mxu0 %v2834_v52  ;;  %2542 = vmatprep.subr.bf16.mxu1 %v2834_v52  ;;  %v2772_v12 = vld [vmem:[%s3016_s6 + $0x38] sm:$0xff]   ;;  %v2774_v14 = vld [vmem:[%s3016_s6 + $0x40] sm:$0xff]   ;;  %v2775_v15 = vld [vmem:[%s3016_s6 + $0xa8] sm:$0xff]  }
  0x3f   : > { %v2776_v16 = vld [vmem:[%s3016_s6 + $0x48] sm:$0xff]   ;;  %v2777_v17 = vld [vmem:[%s3016_s6 + $0xb0] sm:$0xff]   ;;  %v2779_v19 = vld [vmem:[%s3016_s6 + $0xb8] sm:$0xff]  }
  0x40   : > { %v2778_v18 = vld [vmem:[%s3016_s6 + $0x50] sm:$0xff]   ;;  %v2780_v20 = vld [vmem:[%s3016_s6 + $0x58] sm:$0xff]   ;;  %v2781_v21 = vld [vmem:[%s3016_s6 + $0xc0] sm:$0xff]  }
  0x41   : > { %2481 = vmatpush3.bf16.msra.mxu0 %v2755_v59  ;;  %2543 = vmatpush3.bf16.msra.mxu1 %v2755_v59  ;;  %v2782_v22 = vld [vmem:[%s3016_s6 + $0x60] sm:$0xff]   ;;  %v2783_v23 = vld [vmem:[%s3016_s6 + $0xc8] sm:$0xff]   ;;  %v2784_v24 = vld [vmem:[%s3016_s6 + $0xd0] sm:$0xff]  }
  0x42   : > { %2482 = vmatprep.subr.bf16.mxu0 %v2834_v52  ;;  %2544 = vmatprep.subr.bf16.mxu1 %v2834_v52  ;;  %v2785_v25 = vld [vmem:[%s3016_s6 + $0x138] sm:$0xff]   ;;  %v2787_v27 = vld [vmem:[%s3016_s6 + $0x140] sm:$0xff]   ;;  %v2789_v29 = vld [vmem:[%s3016_s6 + $0x148] sm:$0xff]  }
  0x43   : > { %v2786_v26 = vld [vmem:[%s3016_s6 + $0xd8] sm:$0xff]   ;;  %v2788_v28 = vld [vmem:[%s3016_s6 + $0xe0] sm:$0xff]   ;;  %v2790_v30 = vld [vmem:[%s3016_s6 + $0xe8] sm:$0xff]  }
  0x44   : > { %v2791_v31 = vld [vmem:[%s3016_s6 + $0x150] sm:$0xff]   ;;  %v2793_v33 = vld [vmem:[%s3016_s6 + $0x158] sm:$0xff]   ;;  %v2795_v35 = vld [vmem:[%s3016_s6 + $0x160] sm:$0xff]  }
  0x45   : > { %2483 = vmatpush3.bf16.msra.mxu0 %v2756_v60  ;;  %2545 = vmatpush3.bf16.msra.mxu1 %v2756_v60  ;;  %v2792_v32 = vld [vmem:[%s3016_s6 + $0xf0] sm:$0xff]   ;;  %v2794_v34 = vld [vmem:[%s3016_s6 + $0xf8] sm:$0xff]   ;;  %v2796_v36 = vld [vmem:[%s3016_s6 + $0x100] sm:$0xff]  }
  0x46   : > { %2484 = vmatprep.subr.bf16.mxu0 %v2834_v52  ;;  %2546 = vmatprep.subr.bf16.mxu1 %v2834_v52  ;;  %v2797_v37 = vld [vmem:[%s3016_s6 + $0x168] sm:$0xff]   ;;  %v2799_v39 = vld [vmem:[%s3016_s6 + $0x170] sm:$0xff]   ;;  %v2801_v41 = vld [vmem:[%s3016_s6 + $0x178] sm:$0xff]  }
  0x47   : > { %v2798_v38 = vld [vmem:[%s3016_s6 + $0x108] sm:$0xff]   ;;  %v2800_v40 = vld [vmem:[%s3016_s6 + $0x110] sm:$0xff]   ;;  %v2802_v42 = vld [vmem:[%s3016_s6 + $0x118] sm:$0xff]  }
  0x48   : > { %v2803_v43 = vld [vmem:[%s3016_s6 + $0x180] sm:$0xff]   ;;  %v2805_v45 = vld [vmem:[%s3016_s6 + $0x188] sm:$0xff]   ;;  %v2807_v47 = vld [vmem:[%s3016_s6 + $0x190] sm:$0xff]  }
  0x49   : > { %2485 = vmatpush3.bf16.msra.mxu0 %v2757_v61  ;;  %2547 = vmatpush3.bf16.msra.mxu1 %v2757_v61  ;;  %v2804_v44 = vld [vmem:[%s3016_s6 + $0x120] sm:$0xff]   ;;  %v2806_v46 = vld [vmem:[%s3016_s6 + $0x128] sm:$0xff]   ;;  %v2808_v56 = vld [vmem:[%s3016_s6 + $0x130] sm:$0xff]  }
  0x4a   : > { %2600 = vmatprep.subr.bf16.mxu0 %v2834_v52  ;;  %2662 = vmatprep.subr.bf16.mxu1 %v2834_v52 }
  0x4c   : > { %2487 = vmatmul.mubr.msk.bf16.vlgmr.msra.gmra.mxu0 %vm760_vm3, %v2758_v62  ;;  %2549 = vmatmul.mubr.msk.bf16.vlgmr.msra.gmra.mxu1 %vm760_vm3, %v2759_v63 }
  0x4d   : > { %2601 = vmatpush3.bf16.msra.mxu0 %v805_v57  ;;  %2663 = vmatpush3.bf16.msra.mxu1 %v805_v57  ;;  %v2809_v57 = vld [vmem:[%s3016_s6 + $0x198] sm:$0xff]  }
  0x4e   : > { %2490 = vmatprep.mubr.msk.bf16.mxu0 %vm2836_vm2, %v2834_v52  ;;  %2552 = vmatprep.mubr.msk.bf16.mxu1 %vm2836_vm2, %v2834_v52 }
  0x4f   : > { %2602 = vmatprep.subr.bf16.mxu0 %v2834_v52  ;;  %2664 = vmatprep.subr.bf16.mxu1 %v2834_v52 }
  0x51   : > { %2603 = vmatpush3.bf16.msra.mxu0 %v2754_v58  ;;  %2665 = vmatpush3.bf16.msra.mxu1 %v2754_v58 }
  0x52   : > { %2604 = vmatprep.subr.bf16.mxu0 %v2834_v52  ;;  %2666 = vmatprep.subr.bf16.mxu1 %v2834_v52 }
  0x54   : > { %2491 = vmatmul.mubr.msk.bf16.gmra.mxu0 %vm760_vm3, %v2760_v0  ;;  %2553 = vmatmul.mubr.msk.bf16.gmra.mxu1 %vm760_vm3, %v2761_v1 }
  0x55   : > { %2494 = vmatprep.mubr.msk.bf16.mxu0 %vm2836_vm2, %v2834_v52  ;;  %2556 = vmatprep.mubr.msk.bf16.mxu1 %vm2836_vm2, %v2834_v52 }
  0x56   : > { %2605 = vmatpush3.bf16.msra.mxu0 %v2755_v59  ;;  %2667 = vmatpush3.bf16.msra.mxu1 %v2755_v59 }
  0x57   : > { %2606 = vmatprep.subr.bf16.mxu0 %v2834_v52  ;;  %2668 = vmatprep.subr.bf16.mxu1 %v2834_v52 }
  0x5a   : > { %2607 = vmatpush3.bf16.msra.mxu0 %v2756_v60  ;;  %2669 = vmatpush3.bf16.msra.mxu1 %v2756_v60 }
  0x5b   : > { %2608 = vmatprep.subr.bf16.mxu0 %v2834_v52  ;;  %2670 = vmatprep.subr.bf16.mxu1 %v2834_v52 }
  0x5c   : > { %2495 = vmatmul.mubr.msk.bf16.gmra.mxu0 %vm760_vm3, %v2762_v2  ;;  %2557 = vmatmul.mubr.msk.bf16.gmra.mxu1 %vm760_vm3, %v2763_v3 }
  0x5d   : > { %2498 = vmatprep.mubr.msk.bf16.mxu0 %vm2836_vm2, %v2834_v52  ;;  %2560 = vmatprep.mubr.msk.bf16.mxu1 %vm2836_vm2, %v2834_v52 }
  0x5e   : > { %2609 = vmatpush3.bf16.msra.mxu0 %v2757_v61  ;;  %2671 = vmatpush3.bf16.msra.mxu1 %v2757_v61 }
  0x64   : > { %2499 = vmatmul.mubr.msk.bf16.gmra.mxu0 %vm760_vm3, %v2764_v4  ;;  %2561 = vmatmul.mubr.msk.bf16.gmra.mxu1 %vm760_vm3, %v2765_v5 }
  0x65   : > { %2502 = vmatprep.mubr.msk.bf16.mxu0 %vm2836_vm2, %v2834_v52  ;;  %2564 = vmatprep.mubr.msk.bf16.mxu1 %vm2836_vm2, %v2834_v52 }
  0x6c   : > { %2503 = vmatmul.mubr.msk.bf16.gmra.mxu0 %vm760_vm3, %v2766_v6  ;;  %2565 = vmatmul.mubr.msk.bf16.gmra.mxu1 %vm760_vm3, %v2767_v7 }
  0x6d   : > { %2506 = vmatprep.mubr.msk.bf16.mxu0 %vm2836_vm2, %v2834_v52  ;;  %2568 = vmatprep.mubr.msk.bf16.mxu1 %vm2836_vm2, %v2834_v52 }
  0x74   : > { %2507 = vmatmul.mubr.msk.bf16.gmra.mxu0 %vm760_vm3, %v2768_v8  ;;  %2569 = vmatmul.mubr.msk.bf16.gmra.mxu1 %vm760_vm3, %v2769_v9 }
  0x75   : > { %2510 = vmatprep.mubr.msk.bf16.mxu0 %vm2836_vm2, %v2834_v52  ;;  %2572 = vmatprep.mubr.msk.bf16.mxu1 %vm2836_vm2, %v2834_v52 }
  0x7c   : > { %2511 = vmatmul.mubr.msk.bf16.gmra.mxu0 %vm760_vm3, %v2770_v10  ;;  %2573 = vmatmul.mubr.msk.bf16.gmra.mxu1 %vm760_vm3, %v2771_v11 }
  0x7d   : > { %2514 = vmatprep.mubr.msk.bf16.mxu0 %vm2836_vm2, %v2834_v52  ;;  %2576 = vmatprep.mubr.msk.bf16.mxu1 %vm2836_vm2, %v2834_v52 }
  0x84   : > { %2515 = vmatmul.mubr.msk.bf16.gmra.mxu0 %vm760_vm3, %v2772_v12  ;;  %2577 = vmatmul.mubr.msk.bf16.gmra.mxu1 %vm760_vm3, %v2773_v13 }
  0x85   : > { %2518 = vmatprep.mubr.msk.bf16.mxu0 %vm2836_vm2, %v2834_v52  ;;  %2580 = vmatprep.mubr.msk.bf16.mxu1 %vm2836_vm2, %v2834_v52 }
  0x8c   : > { %2519 = vmatmul.mubr.msk.bf16.gmra.mxu0 %vm760_vm3, %v2774_v14  ;;  %2581 = vmatmul.mubr.msk.bf16.gmra.mxu1 %vm760_vm3, %v2775_v15 }
  0x8d   : > { %2522 = vmatprep.mubr.msk.bf16.mxu0 %vm2836_vm2, %v2834_v52  ;;  %2584 = vmatprep.mubr.msk.bf16.mxu1 %vm2836_vm2, %v2834_v52 }
  0x94   : > { %2523 = vmatmul.mubr.msk.bf16.gmra.mxu0 %vm760_vm3, %v2776_v16  ;;  %2585 = vmatmul.mubr.msk.bf16.gmra.mxu1 %vm760_vm3, %v2777_v17 }
  0x95   : > { %2526 = vmatprep.mubr.msk.bf16.mxu0 %vm2836_vm2, %v2834_v52  ;;  %2588 = vmatprep.mubr.msk.bf16.mxu1 %vm2836_vm2, %v2834_v52 }
  0x9c   : > { %2527 = vmatmul.mubr.msk.bf16.gmra.mxu0 %vm760_vm3, %v2778_v18  ;;  %2589 = vmatmul.mubr.msk.bf16.gmra.mxu1 %vm760_vm3, %v2779_v19 }
  0x9d   : > { %2530 = vmatprep.mubr.msk.bf16.mxu0 %vm2836_vm2, %v2834_v52  ;;  %2592 = vmatprep.mubr.msk.bf16.mxu1 %vm2836_vm2, %v2834_v52 }
  0xa4   : > { %2531 = vmatmul.mubr.msk.bf16.gmra.mxu0 %vm760_vm3, %v2780_v20  ;;  %2593 = vmatmul.mubr.msk.bf16.gmra.mxu1 %vm760_vm3, %v2781_v21 }
  0xa5   : > { %2534 = vmatprep.mubr.msk.bf16.mxu0 %vm2836_vm2, %v2834_v52  ;;  %2596 = vmatprep.mubr.msk.bf16.mxu1 %vm2836_vm2, %v2834_v52 }
  0xac   : > { %2535 = vmatmul.mubr.msk.bf16.gmra.mxu0 %vm760_vm3, %v2782_v22  ;;  %2597 = vmatmul.mubr.msk.bf16.gmra.mxu1 %vm760_vm3, %v2783_v23 }
  0xad   : > { %2610 = vmatprep.mubr.msk.bf16.mxu0 %vm2836_vm2, %v2834_v52  ;;  %2672 = vmatprep.mubr.msk.bf16.mxu1 %vm2836_vm2, %v2834_v52 }
  0xb4   : > { %2611 = vmatmul.mubr.msk.bf16.vlgmr.msra.gmra.mxu0 %vm760_vm3, %v2784_v24  ;;  %2673 = vmatmul.mubr.msk.bf16.vlgmr.msra.gmra.mxu1 %vm760_vm3, %v2785_v25 }
  0xb5   : > { %2614 = vmatprep.mubr.msk.bf16.mxu0 %vm2836_vm2, %v2834_v52  ;;  %2676 = vmatprep.mubr.msk.bf16.mxu1 %vm2836_vm2, %v2834_v52 }
  0xbc   : > { %2615 = vmatmul.mubr.msk.bf16.gmra.mxu0 %vm760_vm3, %v2786_v26  ;;  %2677 = vmatmul.mubr.msk.bf16.gmra.mxu1 %vm760_vm3, %v2787_v27 }
  0xbd   : > { %2618 = vmatprep.mubr.msk.bf16.mxu0 %vm2836_vm2, %v2834_v52  ;;  %2680 = vmatprep.mubr.msk.bf16.mxu1 %vm2836_vm2, %v2834_v52 }
  0xc4   : > { %2619 = vmatmul.mubr.msk.bf16.gmra.mxu0 %vm760_vm3, %v2788_v28  ;;  %2681 = vmatmul.mubr.msk.bf16.gmra.mxu1 %vm760_vm3, %v2789_v29 }
  0xc5   : > { %2622 = vmatprep.mubr.msk.bf16.mxu0 %vm2836_vm2, %v2834_v52  ;;  %2684 = vmatprep.mubr.msk.bf16.mxu1 %vm2836_vm2, %v2834_v52 }
  0xcc   : > { %2623 = vmatmul.mubr.msk.bf16.gmra.mxu0 %vm760_vm3, %v2790_v30  ;;  %2685 = vmatmul.mubr.msk.bf16.gmra.mxu1 %vm760_vm3, %v2791_v31 }
  0xcd   : > { %2626 = vmatprep.mubr.msk.bf16.mxu0 %vm2836_vm2, %v2834_v52  ;;  %2688 = vmatprep.mubr.msk.bf16.mxu1 %vm2836_vm2, %v2834_v52 }
  0xd4   : > { %2627 = vmatmul.mubr.msk.bf16.gmra.mxu0 %vm760_vm3, %v2792_v32  ;;  %2689 = vmatmul.mubr.msk.bf16.gmra.mxu1 %vm760_vm3, %v2793_v33 }
  0xd5   : > { %2630 = vmatprep.mubr.msk.bf16.mxu0 %vm2836_vm2, %v2834_v52  ;;  %2692 = vmatprep.mubr.msk.bf16.mxu1 %vm2836_vm2, %v2834_v52 }
  0xdc   : > { %2631 = vmatmul.mubr.msk.bf16.gmra.mxu0 %vm760_vm3, %v2794_v34  ;;  %2693 = vmatmul.mubr.msk.bf16.gmra.mxu1 %vm760_vm3, %v2795_v35 }
  0xdd   : > { %2634 = vmatprep.mubr.msk.bf16.mxu0 %vm2836_vm2, %v2834_v52  ;;  %2696 = vmatprep.mubr.msk.bf16.mxu1 %vm2836_vm2, %v2834_v52 }
  0xe4   : > { %2635 = vmatmul.mubr.msk.bf16.gmra.mxu0 %vm760_vm3, %v2796_v36  ;;  %2697 = vmatmul.mubr.msk.bf16.gmra.mxu1 %vm760_vm3, %v2797_v37 }
  0xe5   : > { %2638 = vmatprep.mubr.msk.bf16.mxu0 %vm2836_vm2, %v2834_v52  ;;  %2700 = vmatprep.mubr.msk.bf16.mxu1 %vm2836_vm2, %v2834_v52 }
  0xec   : > { %2639 = vmatmul.mubr.msk.bf16.gmra.mxu0 %vm760_vm3, %v2798_v38  ;;  %2701 = vmatmul.mubr.msk.bf16.gmra.mxu1 %vm760_vm3, %v2799_v39 }
  0xed   : > { %2642 = vmatprep.mubr.msk.bf16.mxu0 %vm2836_vm2, %v2834_v52  ;;  %2704 = vmatprep.mubr.msk.bf16.mxu1 %vm2836_vm2, %v2834_v52 }
  0xf4   : > { %2643 = vmatmul.mubr.msk.bf16.gmra.mxu0 %vm760_vm3, %v2800_v40  ;;  %2705 = vmatmul.mubr.msk.bf16.gmra.mxu1 %vm760_vm3, %v2801_v41 }
  0xf5   : > { %2646 = vmatprep.mubr.msk.bf16.mxu0 %vm2836_vm2, %v2834_v52  ;;  %2708 = vmatprep.mubr.msk.bf16.mxu1 %vm2836_vm2, %v2834_v52 }
  0xfc   : > { %2647 = vmatmul.mubr.msk.bf16.gmra.mxu0 %vm760_vm3, %v2802_v42  ;;  %2709 = vmatmul.mubr.msk.bf16.gmra.mxu1 %vm760_vm3, %v2803_v43 }
  0xfd   : > { %2650 = vmatprep.mubr.msk.bf16.mxu0 %vm2836_vm2, %v2834_v52  ;;  %2712 = vmatprep.mubr.msk.bf16.mxu1 %vm2836_vm2, %v2834_v52 }
 0x104   : > { %2651 = vmatmul.mubr.msk.bf16.gmra.mxu0 %vm760_vm3, %v2804_v44  ;;  %2713 = vmatmul.mubr.msk.bf16.gmra.mxu1 %vm760_vm3, %v2805_v45 }
 0x105   : > { %2654 = vmatprep.mubr.msk.bf16.mxu0 %vm2836_vm2, %v2834_v52  ;;  %2716 = vmatprep.mubr.msk.bf16.mxu1 %vm2836_vm2, %v2834_v52 }
 0x10c   : > { %v3237_v48 = vpop.f32.mrf.mxu0  ;;  %v3239_v49 = vpop.f32.mrf.mxu1  ;;  %2655 = vmatmul.mubr.msk.bf16.gmra.mxu0 %vm760_vm3, %v2806_v46  ;;  %2717 = vmatmul.mubr.msk.bf16.gmra.mxu1 %vm760_vm3, %v2807_v47 }
 0x10d   : > { %v1212_v50 = vmax.f32 %v3237_v48, %v3239_v49  ;;  %2658 = vmatprep.mubr.msk.bf16.mxu0 %vm2836_vm2, %v2834_v52  ;;  %2720 = vmatprep.mubr.msk.bf16.mxu1 %vm2836_vm2, %v2834_v52  ;;  %v3411_v52 = vld [vmem:[%s3544_s2] ss:$0 sm:$0xff] }
 0x10e   : > { %v2488_v51 = vpop.f32.mrf.mxu0  ;;  %v2550_v53 = vpop.f32.mrf.mxu1 }
 0x110   : > { %v3249_v54 = vpop.f32.mrf.mxu0  ;;  %v3251_v55 = vpop.f32.mrf.mxu1 }
 0x112   : > { %v2489_v59 = vpop.f32.mrf.mxu0  ;;  %v2551_v60 = vpop.f32.mrf.mxu1 }
 0x114   : > { %v3257_v61 = vpop.f32.mrf.mxu0  ;;  %v3259_v62 = vpop.f32.mrf.mxu1  ;;  %2659 = vmatmul.mubr.msk.bf16.gmra.mxu0 %vm760_vm3, %v2808_v56  ;;  %2721 = vmatmul.mubr.msk.bf16.gmra.mxu1 %vm760_vm3, %v2809_v57 }
 0x116   : > { %v2492_v63 = vpop.f32.mrf.mxu0  ;;  %v2554_v0 = vpop.f32.mrf.mxu1 }
 0x118   : > { %v3265_v1 = vpop.f32.mrf.mxu0  ;;  %v3267_v2 = vpop.f32.mrf.mxu1 }
 0x11a   : > { %v2493_v4 = vpop.f32.mrf.mxu0  ;;  %v2555_v5 = vpop.f32.mrf.mxu1 }
 0x11c   : > { %v3271_v6 = vpop.f32.mrf.mxu0  ;;  %v3273_v7 = vpop.f32.mrf.mxu1 }
 0x11e   : > { %v2496_v9 = vpop.f32.mrf.mxu0  ;;  %v2558_v10 = vpop.f32.mrf.mxu1 }
 0x120   : > { %v3277_v11 = vpop.f32.mrf.mxu0  ;;  %v3279_v12 = vpop.f32.mrf.mxu1 }
 0x122   : > { %v2497_v14 = vpop.f32.mrf.mxu0  ;;  %v2559_v15 = vpop.f32.mrf.mxu1 }
 0x124   : > { %v3283_v16 = vpop.f32.mrf.mxu0  ;;  %v3285_v17 = vpop.f32.mrf.mxu1 }
 0x126   : > { %v2500_v19 = vpop.f32.mrf.mxu0  ;;  %v2562_v20 = vpop.f32.mrf.mxu1 }
 0x128   : > { %v3289_v21 = vpop.f32.mrf.mxu0  ;;  %v3291_v22 = vpop.f32.mrf.mxu1 }
 0x12a   : > { %v2501_v24 = vpop.f32.mrf.mxu0  ;;  %v2563_v25 = vpop.f32.mrf.mxu1 }
 0x12c   : > { %v3295_v26 = vpop.f32.mrf.mxu0  ;;  %v3297_v27 = vpop.f32.mrf.mxu1 }
 0x12e   : > { %v2504_v29 = vpop.f32.mrf.mxu0  ;;  %v2566_v30 = vpop.f32.mrf.mxu1 }
 0x130   : > { %v3301_v31 = vpop.f32.mrf.mxu0  ;;  %v3303_v32 = vpop.f32.mrf.mxu1 }
 0x132   : > { %v2505_v34 = vpop.f32.mrf.mxu0  ;;  %v2567_v35 = vpop.f32.mrf.mxu1 }
 0x134   : > { %v3307_v36 = vpop.f32.mrf.mxu0  ;;  %v3309_v37 = vpop.f32.mrf.mxu1 }
 0x136   : > { %v2508_v39 = vpop.f32.mrf.mxu0  ;;  %v2570_v40 = vpop.f32.mrf.mxu1 }
 0x138   : > { %v3313_v41 = vpop.f32.mrf.mxu0  ;;  %v3315_v42 = vpop.f32.mrf.mxu1 }
 0x13a   : > { %v2509_v44 = vpop.f32.mrf.mxu0  ;;  %v2571_v45 = vpop.f32.mrf.mxu1 }
 0x13c   : > { %v3319_v46 = vpop.f32.mrf.mxu0  ;;  %v3321_v47 = vpop.f32.mrf.mxu1 }
 0x13e   : > { %v2512_v53 = vpop.f32.mrf.mxu0  ;;  %v2574_v56 = vpop.f32.mrf.mxu1 }
 0x140   : > { %v3325_v57 = vpop.f32.mrf.mxu0  ;;  %v3327_v59 = vpop.f32.mrf.mxu1 }
 0x142   : > { %v2513_v63 = vpop.f32.mrf.mxu0  ;;  %v2575_v0 = vpop.f32.mrf.mxu1 }
 0x144   : > { %v3331_v4 = vpop.f32.mrf.mxu0  ;;  %v3333_v5 = vpop.f32.mrf.mxu1 }
 0x146   : > { %v2516_v10 = vpop.f32.mrf.mxu0  ;;  %v2578_v14 = vpop.f32.mrf.mxu1 }
 0x148   : > { %v3337_v15 = vpop.f32.mrf.mxu0  ;;  %v3339_v19 = vpop.f32.mrf.mxu1 }
 0x14a   : > { %v2517_v24 = vpop.f32.mrf.mxu0  ;;  %v2579_v25 = vpop.f32.mrf.mxu1 }
 0x14c   : > { %v3343_v29 = vpop.f32.mrf.mxu0  ;;  %v3345_v30 = vpop.f32.mrf.mxu1 }
 0x14e   : > { %v2520_v35 = vpop.f32.mrf.mxu0  ;;  %v2582_v39 = vpop.f32.mrf.mxu1 }
 0x150   : > { %v3349_v40 = vpop.f32.mrf.mxu0  ;;  %v3351_v44 = vpop.f32.mrf.mxu1 }
 0x152   : > { %v2521_v53 = vpop.f32.mrf.mxu0  ;;  %v2583_v56 = vpop.f32.mrf.mxu1 }
 0x154   : > { %v3355_v63 = vpop.f32.mrf.mxu0  ;;  %v3357_v0 = vpop.f32.mrf.mxu1 }
 0x156   : > { %v2524_v14 = vpop.f32.mrf.mxu0  ;;  %v2586_v24 = vpop.f32.mrf.mxu1 }
 0x158   : > { %v3361_v25 = vpop.f32.mrf.mxu0  ;;  %v3363_v35 = vpop.f32.mrf.mxu1 }
 0x15a   : > { %v2525_v34 = vpop.f32.mrf.mxu0  ;;  %v2587_v45 = vpop.f32.mrf.mxu1 }
 0x15c   : > { %v3367_v53 = vpop.f32.mrf.mxu0  ;;  %v3369_v56 = vpop.f32.mrf.mxu1 }
 0x15e   : > { %v2528_v9 = vpop.f32.mrf.mxu0  ;;  %v2590_v10 = vpop.f32.mrf.mxu1 }
 0x160   : > { %v3373_v14 = vpop.f32.mrf.mxu0  ;;  %v3375_v24 = vpop.f32.mrf.mxu1 }
 0x162   : > { %v2529_v51 = vpop.f32.mrf.mxu0  ;;  %v2591_v39 = vpop.f32.mrf.mxu1 }
 0x164   : > { %v3379_v34 = vpop.f32.mrf.mxu0  ;;  %v3381_v45 = vpop.f32.mrf.mxu1 }
 0x166   : > { %v2532_v20 = vpop.f32.mrf.mxu0  ;;  %v2594_v9 = vpop.f32.mrf.mxu1 }
 0x168   : > { %v3385_v10 = vpop.f32.mrf.mxu0  ;;  %v3387_v38 = vpop.f32.mrf.mxu1 }
 0x16a   : > { %v2533_v60 = vpop.f32.mrf.mxu0  ;;  %v2595_v51 = vpop.f32.mrf.mxu1 }
 0x16c   : > { %v3391_v39 = vpop.f32.mrf.mxu0  ;;  %v3393_v28 = vpop.f32.mrf.mxu1 }
 0x16d   : > { %3550 = vst [vmem:[#allocation3_spill] sm:$0xff] %v3391_v39  ;;  %3551 = vst [vmem:[#allocation4_spill] sm:$0xff] %v3393_v28 }
 0x16e   : > { %v2536_v43 = vpop.f32.mrf.mxu0  ;;  %v2598_v18 = vpop.f32.mrf.mxu1 }
 0x170   : > { %v3397_v20 = vpop.f32.mrf.mxu0  ;;  %v3399_v9 = vpop.f32.mrf.mxu1 }
 0x171   : > { %3552 = vst [vmem:[#allocation5_spill] sm:$0xff] %v3397_v20  ;;  %3553 = vst [vmem:[#allocation6_spill] sm:$0xff] %v3399_v9 }
 0x172   : > { %v2537_v60 = vpop.f32.mrf.mxu0  ;;  %v2599_v51 = vpop.f32.mrf.mxu1 }
 0x173   : > { %v3554_v60 = vmax.f32 %v3249_v54, %v3251_v55 }
 0x174   : > { %v1403_v33 = vpop.f32.mrf.mxu0  ;;  %v1697_v8 = vpop.f32.mrf.mxu1 }
 0x175   : > { %v1506_v3 = vmax.f32 %v1212_v50, %v1403_v33 }
 0x176   : > { %v2612_v43 = vpop.f32.mrf.mxu0  ;;  %v2674_v18 = vpop.f32.mrf.mxu1 }
 0x177   : > { %v1800_v23 = vmax.f32 %v1506_v3, %v1697_v8  ;;  %v3555_v8 = vmax.f32 %v3257_v61, %v3259_v62 }
 0x178   : > { %v1406_v13 = vpop.f32.mrf.mxu0  ;;  %v1700_v58 = vpop.f32.mrf.mxu1 }
 0x179   : > { %v1507_v51 = vmax.f32 %v3554_v60, %v1406_v13  ;;  %v1833_v48 = vadd.f32 %v3411_v52, %v1800_v23 }
 0x17a   : > { %v2613_v9 = vpop.f32.mrf.mxu0  ;;  %v2675_v20 = vpop.f32.mrf.mxu1 }
 0x17b   : > { %v1801_v49 = vmax.f32 %v1507_v51, %v1700_v58  ;;  %v1859_v39 = vmax.f32 %v1833_v48, 0.0  ;;  %v3556_v20 = vmax.f32 %v3265_v1, %v3267_v2 }
 0x17c   : > { %v1411_v50 = vpop.f32.mrf.mxu0  ;;  %v1705_v33 = vpop.f32.mrf.mxu1 }
 0x17d   : > { %v1834_v3 = vadd.f32 %v3411_v52, %v1801_v49  ;;  %v1508_v43 = vmax.f32 %v3555_v8, %v1411_v50  ;;  %v3557_v50 = vmax.f32 %v3271_v6, %v3273_v7 }
 0x17e   : > { %v2616_v18 = vpop.f32.mrf.mxu0  ;;  %v2678_v28 = vpop.f32.mrf.mxu1 }
 0x17f   : > { %v1860_v54 = vmax.f32 %v1834_v3, 0.0  ;;  %v1802_v55 = vmax.f32 %v1508_v43, %v1705_v33 }
 0x180   : > { %v1414_v58 = vpop.f32.mrf.mxu0  ;;  %v1708_v13 = vpop.f32.mrf.mxu1 }
 0x181   : > { %v2330_v23 = vpack.c.bf16 %v1860_v54, %v1859_v39  ;;  %v1509_v9 = vmax.f32 %v3556_v20, %v1414_v58  ;;  %v1835_v28 = vadd.f32 %v3411_v52, %v1802_v55  ;;  %v3558_v55 = vmax.f32 %v3277_v11, %v3279_v12 }
 0x182   : > { %v2617_v61 = vpop.f32.mrf.mxu0  ;;  %v2679_v62 = vpop.f32.mrf.mxu1 }
 0x183   : > { %2331 = vst [vmem:[%s3424_s22] sm:$0xff] %v2330_v23   ;;  %v1803_v60 = vmax.f32 %v1509_v9, %v1708_v13  ;;  %v1861_v8 = vmax.f32 %v1835_v28, 0.0  ;;  %v3559_v62 = vmax.f32 %v3283_v16, %v3285_v17 }
 0x184   : > { %v1419_v51 = vpop.f32.mrf.mxu0  ;;  %v1713_v48 = vpop.f32.mrf.mxu1 }
 0x185   : > { %v1836_v49 = vadd.f32 %v3411_v52, %v1803_v60  ;;  %v1510_v33 = vmax.f32 %v3557_v50, %v1419_v51 }
 0x186   : > { %v2620_v39 = vpop.f32.mrf.mxu0  ;;  %v2682_v3 = vpop.f32.mrf.mxu1 }
 0x187   : > { %v1862_v1 = vmax.f32 %v1836_v49, 0.0  ;;  %v1804_v2 = vmax.f32 %v1510_v33, %v1713_v48  ;;  %v3560_v39 = vmax.f32 %v3289_v21, %v3291_v22 }
 0x188   : > { %v1422_v43 = vpop.f32.mrf.mxu0  ;;  %v1716_v18 = vpop.f32.mrf.mxu1 }
 0x189   : > { %v2335_v54 = vpack.c.bf16 %v1862_v1, %v1861_v8  ;;  %v1511_v58 = vmax.f32 %v3558_v55, %v1422_v43  ;;  %v1837_v20 = vadd.f32 %v3411_v52, %v1804_v2 }
 0x18a   : > { %v2621_v13 = vpop.f32.mrf.mxu0  ;;  %v2683_v23 = vpop.f32.mrf.mxu1 }
 0x18b   : > { %2392 = vst [vmem:[%s3424_s22 + $0x8] sm:$0xff] %v2335_v54   ;;  %v1805_v9 = vmax.f32 %v1511_v58, %v1716_v18  ;;  %v1863_v48 = vmax.f32 %v1837_v20, 0.0  ;;  %v3561_v54 = vmax.f32 %v3295_v26, %v3297_v27 }
 0x18c   : > { %v1427_v6 = vpop.f32.mrf.mxu0  ;;  %v1721_v7 = vpop.f32.mrf.mxu1 }
 0x18d   : > { %v1838_v61 = vadd.f32 %v3411_v52, %v1805_v9  ;;  %v1512_v28 = vmax.f32 %v3559_v62, %v1427_v6 }
 0x18e   : > { %v2624_v60 = vpop.f32.mrf.mxu0  ;;  %v2686_v51 = vpop.f32.mrf.mxu1 }
 0x18f   : > { %v1864_v11 = vmax.f32 %v1838_v61, 0.0  ;;  %v1806_v12 = vmax.f32 %v1512_v28, %v1721_v7  ;;  %v3562_v7 = vmax.f32 %v3301_v31, %v3303_v32 }
 0x190   : > { %v1430_v49 = vpop.f32.mrf.mxu0  ;;  %v1724_v50 = vpop.f32.mrf.mxu1 }
 0x191   : > { %v2340_v33 = vpack.c.bf16 %v1864_v11, %v1863_v48  ;;  %v1513_v3 = vmax.f32 %v3560_v39, %v1430_v49  ;;  %v1839_v2 = vadd.f32 %v3411_v52, %v1806_v12  ;;  %v3563_v11 = vmax.f32 %v3307_v36, %v3309_v37 }
 0x192   : > { %v2625_v8 = vpop.f32.mrf.mxu0  ;;  %v2687_v1 = vpop.f32.mrf.mxu1 }
 0x193   : > { %2393 = vst [vmem:[%s3424_s22 + $0x10] sm:$0xff] %v2340_v33   ;;  %v1807_v43 = vmax.f32 %v1513_v3, %v1724_v50  ;;  %v1865_v23 = vmax.f32 %v1839_v2, 0.0  ;;  %v3564_v1 = vmax.f32 %v3313_v41, %v3315_v42 }
 0x194   : > { %v1435_v16 = vpop.f32.mrf.mxu0  ;;  %v1729_v17 = vpop.f32.mrf.mxu1 }
 0x195   : > { %v1840_v18 = vadd.f32 %v3411_v52, %v1807_v43  ;;  %v1514_v55 = vmax.f32 %v3561_v54, %v1435_v16 }
 0x196   : > { %v2628_v58 = vpop.f32.mrf.mxu0  ;;  %v2690_v13 = vpop.f32.mrf.mxu1 }
 0x197   : > { %v1866_v21 = vmax.f32 %v1840_v18, 0.0  ;;  %v1808_v22 = vmax.f32 %v1514_v55, %v1729_v17  ;;  %v3565_v55 = vmax.f32 %v3319_v46, %v3321_v47 }
 0x198   : > { %v1438_v20 = vpop.f32.mrf.mxu0  ;;  %v1732_v9 = vpop.f32.mrf.mxu1 }
 0x199   : > { %v2345_v6 = vpack.c.bf16 %v1866_v21, %v1865_v23  ;;  %v1515_v61 = vmax.f32 %v3562_v7, %v1438_v20  ;;  %v1841_v60 = vadd.f32 %v3411_v52, %v1808_v22 }
 0x19a   : > { %v2629_v62 = vpop.f32.mrf.mxu0  ;;  %v2691_v28 = vpop.f32.mrf.mxu1 }
 0x19b   : > { %2394 = vst [vmem:[%s3424_s22 + $0x18] sm:$0xff] %v2345_v6   ;;  %v1809_v51 = vmax.f32 %v1515_v61, %v1732_v9  ;;  %v1867_v33 = vmax.f32 %v1841_v60, 0.0  ;;  %v3566_v6 = vmax.f32 %v3325_v57, %v3327_v59 }
 0x19c   : > { %v1443_v26 = vpop.f32.mrf.mxu0  ;;  %v1737_v27 = vpop.f32.mrf.mxu1 }
 0x19d   : > { %v1842_v48 = vadd.f32 %v3411_v52, %v1809_v51  ;;  %v1516_v12 = vmax.f32 %v3563_v11, %v1443_v26  ;;  %v3567_v26 = vmax.f32 %v3331_v4, %v3333_v5 }
 0x19e   : > { %v2632_v49 = vpop.f32.mrf.mxu0  ;;  %v2694_v50 = vpop.f32.mrf.mxu1 }
 0x19f   : > { %v1868_v31 = vmax.f32 %v1842_v48, 0.0  ;;  %v1810_v32 = vmax.f32 %v1516_v12, %v1737_v27 }
 0x1a0   : > { %v1446_v39 = vpop.f32.mrf.mxu0  ;;  %v1740_v3 = vpop.f32.mrf.mxu1 }
 0x1a1   : > { %v2350_v8 = vpack.c.bf16 %v1868_v31, %v1867_v33  ;;  %v1517_v2 = vmax.f32 %v3564_v1, %v1446_v39  ;;  %v1843_v17 = vadd.f32 %v3411_v52, %v1810_v32  ;;  %v3568_v31 = vmax.f32 %v3337_v15, %v3339_v19 }
 0x1a2   : > { %v2633_v43 = vpop.f32.mrf.mxu0  ;;  %v2695_v16 = vpop.f32.mrf.mxu1 }
 0x1a3   : > { %2395 = vst [vmem:[%s3424_s22 + $0x20] sm:$0xff] %v2350_v8   ;;  %v1811_v18 = vmax.f32 %v1517_v2, %v1740_v3  ;;  %v1869_v21 = vmax.f32 %v1843_v17, 0.0  ;;  %v3569_v43 = vmax.f32 %v3343_v29, %v3345_v30 }
 0x1a4   : > { %v1451_v36 = vpop.f32.mrf.mxu0  ;;  %v1745_v37 = vpop.f32.mrf.mxu1 }
 0x1a5   : > { %v1844_v54 = vadd.f32 %v3411_v52, %v1811_v18  ;;  %v1518_v58 = vmax.f32 %v3565_v55, %v1451_v36 }
 0x1a6   : > { %v2636_v13 = vpop.f32.mrf.mxu0  ;;  %v2698_v23 = vpop.f32.mrf.mxu1 }
 0x1a7   : > { %v1870_v41 = vmax.f32 %v1844_v54, 0.0  ;;  %v1812_v42 = vmax.f32 %v1518_v58, %v1745_v37  ;;  %v3570_v58 = vmax.f32 %v3349_v40, %v3351_v44 }
 0x1a8   : > { %v1454_v22 = vpop.f32.mrf.mxu0  ;;  %v1748_v20 = vpop.f32.mrf.mxu1 }
 0x1a9   : > { %v2355_v9 = vpack.c.bf16 %v1870_v41, %v1869_v21  ;;  %v1519_v7 = vmax.f32 %v3566_v6, %v1454_v22  ;;  %v1845_v28 = vadd.f32 %v3411_v52, %v1812_v42 }
 0x1aa   : > { %v2637_v61 = vpop.f32.mrf.mxu0  ;;  %v2699_v62 = vpop.f32.mrf.mxu1 }
 0x1ab   : > { %2396 = vst [vmem:[%s3424_s22 + $0x28] sm:$0xff] %v2355_v9   ;;  %v1813_v60 = vmax.f32 %v1519_v7, %v1748_v20  ;;  %v1871_v12 = vmax.f32 %v1845_v28, 0.0  ;;  %v3571_v20 = vmax.f32 %v3355_v63, %v3357_v0 }
 0x1ac   : > { %v1459_v46 = vpop.f32.mrf.mxu0  ;;  %v1753_v47 = vpop.f32.mrf.mxu1 }
 0x1ad   : > { %v1846_v51 = vadd.f32 %v3411_v52, %v1813_v60  ;;  %v1520_v27 = vmax.f32 %v3567_v26, %v1459_v46  ;;  %v3572_v46 = vmax.f32 %v3361_v25, %v3363_v35 }
 0x1ae   : > { %v2640_v48 = vpop.f32.mrf.mxu0  ;;  %v2702_v11 = vpop.f32.mrf.mxu1 }
 0x1af   : > { %v1872_v57 = vmax.f32 %v1846_v51, 0.0  ;;  %v1814_v59 = vmax.f32 %v1520_v27, %v1753_v47 }
 0x1b0   : > { %v1462_v49 = vpop.f32.mrf.mxu0  ;;  %v1756_v50 = vpop.f32.mrf.mxu1 }
 0x1b1   : > { %v2360_v33 = vpack.c.bf16 %v1872_v57, %v1871_v12  ;;  %v1521_v32 = vmax.f32 %v3568_v31, %v1462_v49  ;;  %v1847_v8 = vadd.f32 %v3411_v52, %v1814_v59  ;;  %v3573_v12 = vmax.f32 %v3367_v53, %v3369_v56 }
 0x1b2   : > { %v2641_v39 = vpop.f32.mrf.mxu0  ;;  %v2703_v3 = vpop.f32.mrf.mxu1 }
 0x1b3   : > { %2397 = vst [vmem:[%s3424_s22 + $0x30] sm:$0xff] %v2360_v33   ;;  %v1815_v1 = vmax.f32 %v1521_v32, %v1756_v50  ;;  %v1873_v36 = vmax.f32 %v1847_v8, 0.0  ;;  %v3574_v39 = vmax.f32 %v3373_v14, %v3375_v24 }
 0x1b4   : > { %v1467_v4 = vpop.f32.mrf.mxu0  ;;  %v1761_v5 = vpop.f32.mrf.mxu1 }
 0x1b5   : > { %v1848_v2 = vadd.f32 %v3411_v52, %v1815_v1  ;;  %v1522_v16 = vmax.f32 %v3569_v43, %v1467_v4  ;;  %v3575_v43 = vmax.f32 %v3379_v34, %v3381_v45 }
 0x1b6   : > { %v2644_v17 = vpop.f32.mrf.mxu0  ;;  %v2706_v18 = vpop.f32.mrf.mxu1 }
 0x1b7   : > { %v1874_v15 = vmax.f32 %v1848_v2, 0.0  ;;  %v1816_v19 = vmax.f32 %v1522_v16, %v1761_v5 }
 0x1b8   : > { %v1470_v37 = vpop.f32.mrf.mxu0  ;;  %v1764_v54 = vpop.f32.mrf.mxu1 }
 0x1b9   : > { %v2365_v55 = vpack.c.bf16 %v1874_v15, %v1873_v36  ;;  %v1523_v13 = vmax.f32 %v3570_v58, %v1470_v37  ;;  %v1849_v41 = vadd.f32 %v3411_v52, %v1816_v19 }
 0x1ba   : > { %v2645_v23 = vpop.f32.mrf.mxu0  ;;  %v2707_v21 = vpop.f32.mrf.mxu1 }
 0x1bb   : > { %2398 = vst [vmem:[%s3424_s22 + $0x38] sm:$0xff] %v2365_v55   ;;  %v1817_v42 = vmax.f32 %v1523_v13, %v1764_v54  ;;  %v1875_v61 = vmax.f32 %v1849_v41, 0.0  ;;  %v3576_v54 = vmax.f32 %v3385_v10, %v3387_v38 }
 0x1bc   : > { %v1475_v29 = vpop.f32.mrf.mxu0  ;;  %v1769_v30 = vpop.f32.mrf.mxu1 }
 0x1bd   : > { %v1850_v22 = vadd.f32 %v3411_v52, %v1817_v42  ;;  %v1524_v9 = vmax.f32 %v3571_v20, %v1475_v29  ;;  %v3577_v42 = vld [vmem:[#allocation3_spill] sm:$0xff]  ;;  %v3578_v29 = vld [vmem:[#allocation4_spill] sm:$0xff] }
 0x1be   : > { %v2648_v6 = vpop.f32.mrf.mxu0  ;;  %v2710_v7 = vpop.f32.mrf.mxu1 }
 0x1bf   : > { %v1876_v40 = vmax.f32 %v1850_v22, 0.0  ;;  %v1818_v44 = vmax.f32 %v1524_v9, %v1769_v30  ;;  %v3579_v30 = vmax.f32 %v3577_v42, %v3578_v29 }
 0x1c0   : > { %v1478_v62 = vpop.f32.mrf.mxu0  ;;  %v1772_v28 = vpop.f32.mrf.mxu1 }
 0x1c1   : > { %v2370_v60 = vpack.c.bf16 %v1876_v40, %v1875_v61  ;;  %v1525_v47 = vmax.f32 %v3572_v46, %v1478_v62  ;;  %v1851_v27 = vadd.f32 %v3411_v52, %v1818_v44  ;;  %v3580_v44 = vld [vmem:[#allocation5_spill] sm:$0xff]  ;;  %v3581_v62 = vld [vmem:[#allocation6_spill] sm:$0xff] }
 0x1c2   : > { %v2649_v51 = vpop.f32.mrf.mxu0  ;;  %v2711_v26 = vpop.f32.mrf.mxu1 }
 0x1c3   : > { %2399 = vst [vmem:[%s3424_s22 + $0x40] sm:$0xff] %v2370_v60   ;;  %v1819_v48 = vmax.f32 %v1525_v47, %v1772_v28  ;;  %v1877_v50 = vmax.f32 %v1851_v27, 0.0  ;;  %v3582_v28 = vmax.f32 %v3580_v44, %v3581_v62 }
 0x1c4   : > { %v1483_v63 = vpop.f32.mrf.mxu0  ;;  %v1777_v0 = vpop.f32.mrf.mxu1 }
 0x1c5   : > { %v1852_v11 = vadd.f32 %v3411_v52, %v1819_v48  ;;  %v1526_v57 = vmax.f32 %v3573_v12, %v1483_v63 }
 0x1c6   : > { %v2652_v59 = vpop.f32.mrf.mxu0  ;;  %v2714_v49 = vpop.f32.mrf.mxu1 }
 0x1c7   : > { %v1878_v25 = vmax.f32 %v1852_v11, 0.0  ;;  %v1820_v35 = vmax.f32 %v1526_v57, %v1777_v0 }
 0x1c8   : > { %v1486_v33 = vpop.f32.mrf.mxu0  ;;  %v1780_v31 = vpop.f32.mrf.mxu1 }
 0x1c9   : > { %v2375_v32 = vpack.c.bf16 %v1878_v25, %v1877_v50  ;;  %v1527_v3 = vmax.f32 %v3574_v39, %v1486_v33  ;;  %v1853_v4 = vadd.f32 %v3411_v52, %v1820_v35 }
 0x1ca   : > { %v2653_v8 = vpop.f32.mrf.mxu0  ;;  %v2715_v1 = vpop.f32.mrf.mxu1 }
 0x1cb   : > { %2400 = vst [vmem:[%s3424_s22 + $0x48] sm:$0xff] %v2375_v32   ;;  %v1821_v5 = vmax.f32 %v1527_v3, %v1780_v31  ;;  %v1879_v36 = vmax.f32 %v1853_v4, 0.0 }
 0x1cc   : > { %v1491_v53 = vpop.f32.mrf.mxu0  ;;  %v1785_v56 = vpop.f32.mrf.mxu1 }
 0x1cd   : > { %v1854_v2 = vadd.f32 %v3411_v52, %v1821_v5  ;;  %v1528_v16 = vmax.f32 %v3575_v43, %v1491_v53 }
 0x1ce   : > { %v2656_v17 = vpop.f32.mrf.mxu0  ;;  %v2718_v18 = vpop.f32.mrf.mxu1 }
 0x1cf   : > { %v1880_v14 = vmax.f32 %v1854_v2, 0.0  ;;  %v1822_v24 = vmax.f32 %v1528_v16, %v1785_v56 }
 0x1d0   : > { %v1494_v15 = vpop.f32.mrf.mxu0  ;;  %v1788_v19 = vpop.f32.mrf.mxu1 }
 0x1d1   : > { %v2380_v37 = vpack.c.bf16 %v1880_v14, %v1879_v36  ;;  %v1529_v55 = vmax.f32 %v3576_v54, %v1494_v15  ;;  %v1855_v23 = vadd.f32 %v3411_v52, %v1822_v24 }
 0x1d2   : > { %v2657_v58 = vpop.f32.mrf.mxu0  ;;  %v2719_v13 = vpop.f32.mrf.mxu1 }
 0x1d3   : > { %2401 = vst [vmem:[%s3424_s22 + $0x50] sm:$0xff] %v2380_v37   ;;  %v1823_v21 = vmax.f32 %v1529_v55, %v1788_v19  ;;  %v1881_v6 = vmax.f32 %v1855_v23, 0.0 }
 0x1d4   : > { %v1499_v34 = vpop.f32.mrf.mxu0  ;;  %v1793_v45 = vpop.f32.mrf.mxu1 }
 0x1d5   : > { %v1856_v41 = vadd.f32 %v3411_v52, %v1823_v21  ;;  %v1530_v22 = vmax.f32 %v3579_v30, %v1499_v34 }
 0x1d6   : > { %v2660_v20 = vpop.f32.mrf.mxu0  ;;  %v2722_v9 = vpop.f32.mrf.mxu1 }
 0x1d7   : > { %v1882_v38 = vmax.f32 %v1856_v41, 0.0  ;;  %v1824_v10 = vmax.f32 %v1530_v22, %v1793_v45 }
 0x1d8   : > { %v1502_v7 = vpop.f32.mrf.mxu0  ;;  %v1796_v61 = vpop.f32.mrf.mxu1 }
 0x1d9   : > { %v2385_v40 = vpack.c.bf16 %v1882_v38, %v1881_v6  ;;  %v1531_v60 = vmax.f32 %v3582_v28, %v1502_v7  ;;  %v1857_v51 = vadd.f32 %v3411_v52, %v1824_v10 }
 0x1da   : > { %v2661_v46 = vpop.f32.mrf.mxu0  ;;  %v2723_v47 = vpop.f32.mrf.mxu1 }
 0x1db   : > { %2402 = vst [vmem:[%s3424_s22 + $0x58] sm:$0xff] %v2385_v40   ;;  %v1825_v26 = vmax.f32 %v1531_v60, %v1796_v61  ;;  %v1883_v48 = vmax.f32 %v1857_v51, 0.0 }
 0x1dd   : > { %v1858_v27 = vadd.f32 %v3411_v52, %v1825_v26 }
 0x1df   : > { %v1884_v63 = vmax.f32 %v1858_v27, 0.0 }
 0x1e1   : > { %v2390_v0 = vpack.c.bf16 %v1884_v63, %v1883_v48 }
 0x1e3   : > { %2403 = vst [vmem:[%s3424_s22 + $0x60] sm:$0xff] %v2390_v0  }
 0x1e4 PF: > { %p10_p9 = scmp.ge.s32.totalorder %s2874_s16, 4   ;;  %s3583_s12 = smov %s2828_s13 }
 0x1e5   : > { %s3584_s13 = smov %s2883_s19  ;;  %s3585_s14 = smov %s2874_s16 }
 0x1e6   :  { %12 = sbr.rel (!%p10_p9) target bundleno = 2 (0x2), region = 111 }

// kernel: lenet_forward.4
= control target key start
LH: loop header
LB: loop body
LE: loop exit
PB: predicated region body
PF: predicated region fallthrough
CT: control target
= control target key end

     0   :  { %s958_s12 = smov 0   ;;  %s960_s13 = smov 0   ;;  %s1175_s0 = inlined_call_operand.vmem [shape: bf16[4,64,150], index: 0, kind: input, shape index: {}]   ;;  %s1176_s1 = inlined_call_operand.vmem [shape: bf16[150,128], index: 1, kind: input, shape index: {}]   ;;  %s1177_s2 = inlined_call_operand.vmem [shape: f32[1,128], index: 2, kind: input, shape index: {}]   ;;  %s1178_s3 = inlined_call_operand.vmem [shape: bf16[64,128], index: 3, kind: output, shape index: {}]  }
   0x1   :  { %s962_s14 = smov 0  }
   0x2 LB: > { %s772_s15 = sadd.s32 4294967295, %s935_s14   ;;  %s975_s16 = sadd.s32 1, %s935_s14   ;;  %s935_s14 = sphi %s962_s14, %s1181_s14   ;;  %s931_s13 = sphi %s960_s13, %s1180_s13   ;;  %s927_s12 = sphi %s958_s12, %s1179_s12  }
   0x3   : > { %s17_s17 = ssub.s32 %s935_s14, %s975_s16  ;;  %s20_s18 = sadd.s32 1, %s931_s13 }
   0x4   : > { %p18_p0 = scmp.eq.s32.totalorder %s17_s17, 0  ;;  %p27_p1 = scmp.ne.s32.totalorder %s931_s13, %s927_s12 }
   0x5   : > { %p28_p2 = scmp.eq.s32.totalorder %s935_s14, 0  ;;  %p775_p4 = scmp.ge.s32.totalorder %s935_s14, 2 }
   0x6   : > { %s984_s19 = scalar_select %p18_p0, %s931_s13, %s20_s18  }
   0x7   : > { %p29_p3 = por %p28_p2, %p27_p1  ;;  %127 = sbr.rel (%p775_p4) target bundleno = 24 (0x18), region = 24 }
   0xc   : > { %130 = sbr.rel (!%p29_p3) target bundleno = 24 (0x18), region = 28  ;;  %s132_s20 = sand.u32 (%p29_p3), 1, %s931_s13  }
   0xd   : > { %s838_s21 = sshll.u32 (%p29_p3), %s935_s14, 5  ;;  %s776_s22 = sshll.u32 (%p29_p3), %s132_s20, 7 }
   0xe   : > { %s992_s25 = scalar_lea.vmem (%p29_p3), %s1175_s0, %s838_s21  ;;  %s134_s26 = scalar_lea.vmem (%p29_p3), [#allocation2], %s776_s22 }
   0xf   : > { %v197_v0 = vld [vmem:[%s992_s25] sm:$0xff] (%p29_p3)  ;;  %v199_v1 = vld [vmem:[%s992_s25 + $0x8] sm:$0xff] (%p29_p3)  ;;  %v201_v2 = vld [vmem:[%s992_s25 + $0x10] sm:$0xff] (%p29_p3) }
  0x10   : > { %198 = vst [vmem:[%s134_s26] sm:$0xff] (%p29_p3), %v197_v0  ;;  %200 = vst [vmem:[%s134_s26 + $0x8] sm:$0xff] (%p29_p3), %v199_v1  ;;  %v203_v3 = vld [vmem:[%s992_s25 + $0x18] sm:$0xff] (%p29_p3)  ;;  %v205_v4 = vld [vmem:[%s992_s25 + $0x40] sm:$0xff] (%p29_p3) }
  0x11   : > { %202 = vst [vmem:[%s134_s26 + $0x10] sm:$0xff] %v201_v2  ;;  %v207_v5 = vld [vmem:[%s992_s25 + $0x48] sm:$0xff]  ;;  %204 = vst [vmem:[%s134_s26 + $0x18] sm:$0xff] %v203_v3  ;;  %v209_v6 = vld [vmem:[%s992_s25 + $0x50] sm:$0xff] }
  0x12   : > { %206 = vst [vmem:[%s134_s26 + $0x20] sm:$0xff] %v205_v4  ;;  %208 = vst [vmem:[%s134_s26 + $0x28] sm:$0xff] %v207_v5  ;;  %v211_v7 = vld [vmem:[%s992_s25 + $0x58] sm:$0xff]  ;;  %v213_v8 = vld [vmem:[%s992_s25 + $0x80] sm:$0xff] }
  0x13   : > { %210 = vst [vmem:[%s134_s26 + $0x30] sm:$0xff] %v209_v6  ;;  %212 = vst [vmem:[%s134_s26 + $0x38] sm:$0xff] %v211_v7  ;;  %v215_v9 = vld [vmem:[%s992_s25 + $0x88] sm:$0xff]  ;;  %v217_v10 = vld [vmem:[%s992_s25 + $0x90] sm:$0xff] }
  0x14   : > { %214 = vst [vmem:[%s134_s26 + $0x40] sm:$0xff] %v213_v8  ;;  %v219_v11 = vld [vmem:[%s992_s25 + $0x98] sm:$0xff]  ;;  %216 = vst [vmem:[%s134_s26 + $0x48] sm:$0xff] %v215_v9  ;;  %v221_v12 = vld [vmem:[%s992_s25 + $0xc0] sm:$0xff] }
  0x15   : > { %218 = vst [vmem:[%s134_s26 + $0x50] sm:$0xff] %v217_v10  ;;  %220 = vst [vmem:[%s134_s26 + $0x58] sm:$0xff] %v219_v11  ;;  %v223_v13 = vld [vmem:[%s992_s25 + $0xc8] sm:$0xff]  ;;  %v225_v14 = vld [vmem:[%s992_s25 + $0xd0] sm:$0xff] }
  0x16   : > { %222 = vst [vmem:[%s134_s26 + $0x60] sm:$0xff] %v221_v12  ;;  %224 = vst [vmem:[%s134_s26 + $0x68] sm:$0xff] %v223_v13  ;;  %v227_v15 = vld [vmem:[%s992_s25 + $0xd8] sm:$0xff] }
  0x17   : > { %226 = vst [vmem:[%s134_s26 + $0x70] sm:$0xff] %v225_v14  ;;  %228 = vst [vmem:[%s134_s26 + $0x78] sm:$0xff] %v227_v15 }
  0x18 PF: > { %p780_p5 = scmp.ge.s32.totalorder %s935_s14, 1  ;;  %p233_p6 = scmp.lt.s32.totalorder %s935_s14, 3 }
  0x1a   : > { %p234_p7 = pnand %p780_p5, %p233_p6 }
  0x1b   : > { %s240_s4 = sand.u32 (!%p234_p7), 1, %s927_s12   ;;  %s782_s28 = sshll.u32 (!%p234_p7), %s772_s15, 2 }
  0x1c   : > { %237 = sbr.rel (%p234_p7) target bundleno = 330 (0x14a), region = 66  ;;  %s781_s5 = sshll.u32 (!%p234_p7), %s240_s4, 7 }
  0x1d   : > { %s1038_s8 = scalar_lea.vmem (!%p234_p7), [#allocation2], %s781_s5  ;;  %p265_p8 = scmp.lt.s32.totalorder (!%p234_p7), %s782_s28, 7 }
  0x21   : > { %v1015_v16 = vld [vmem:[%s1176_s1 + $0x38] sm:$0xff]   ;;  %v937_v17 = vmov 0   ;;  %v1024_v18 = vld [vmem:[%s1176_s1 + $0x30] sm:$0xff]   ;;  %v1034_v19 = vld [vmem:[%s1176_s1 + $0x28] sm:$0xff]   ;;  %vm369_vm0 = vcmask 179200   ;;  %vm376_vm1 = vcmask 1042432  }
  0x22   : > { %380 = vmatprep.subr.bf16.mxu0 %v937_v17  ;;  %458 = vmatprep.subr.bf16.mxu1 %v937_v17  ;;  %v1045_v20 = vld [vmem:[%s1176_s1 + $0x20] sm:$0xff]   ;;  %v1057_v23 = vld [vmem:[%s1176_s1 + $0x18] sm:$0xff]   ;;  %v1067_v24 = vld [vmem:[%s1176_s1 + $0x10] sm:$0xff]   ;;  %s1183_s28 = smov (!%p265_p8, %s782_s28), 7 }
  0x23   : > { %381 = vmatpush1.bf16.msra.mxu0 %v1015_v16  ;;  %459 = vmatpush1.bf16.msra.mxu1 %v1015_v16  ;;  %v891_v21 = vld [vmem:[%s1038_s8 + $0x4] ss:$8 sps:$4 sm:$0xff]   ;;  %v887_v27 = vld [vmem:[%s1176_s1 + $0x48] ss:$0 sps:$4 sm:$0x77]   ;;  %s783_s14 = sshll.u32 %s1183_s28, 2 }
  0x24   : > { %382 = vmatprep.subr.bf16.mxu0 %v937_v17  ;;  %460 = vmatprep.subr.bf16.mxu1 %v937_v17  ;;  %v894_v22 = vld [vmem:[%s1038_s8 + $0x24] ss:$8 sps:$4 sm:$0xff]   ;;  %v378_v28 = vsel %vm376_vm1, %v887_v27, 0  ;;  %v889_v30 = vld [vmem:[%s1038_s8] ss:$8 sps:$4 sm:$0xff]   ;;  %s268_s5 = scalar_lea.vmem %s1178_s3, %s783_s14 }
  0x25   : > { %798 = vmatprep.mubr.msk.bf16.mxu0 %vm369_vm0, %v891_v21  ;;  %808 = vmatprep.mubr.msk.bf16.mxu1 %vm369_vm0, %v894_v22  ;;  %v1076_v25 = vld [vmem:[%s1176_s1 + $0x8] sm:$0xff]   ;;  %v1085_v26 = vld [vmem:[%s1176_s1] sm:$0xff]   ;;  %v895_v32 = vld [vmem:[%s1038_s8 + $0x14] ss:$8 sps:$4 sm:$0xff]  }
  0x26   : > { %v888_v29 = vld [vmem:[%s1176_s1 + $0x40] sm:$0xff]   ;;  %v898_v33 = vld [vmem:[%s1038_s8 + $0x34] ss:$8 sps:$4 sm:$0xff]   ;;  %v897_v34 = vld [vmem:[%s1038_s8 + $0x10] ss:$8 sps:$4 sm:$0xff]  }
  0x27   : > { %383 = vmatpush1.bf16.msra.mxu0 %v1024_v18  ;;  %461 = vmatpush1.bf16.msra.mxu1 %v1024_v18  ;;  %v892_v31 = vld [vmem:[%s1038_s8 + $0x20] ss:$8 sps:$4 sm:$0xff]   ;;  %v900_v35 = vld [vmem:[%s1038_s8 + $0x30] ss:$8 sps:$4 sm:$0xff]   ;;  %v903_v36 = vld [vmem:[%s1038_s8 + $0x44] ss:$8 sps:$4 sm:$0xff]  }
  0x28   : > { %384 = vmatprep.subr.bf16.mxu0 %v937_v17  ;;  %462 = vmatprep.subr.bf16.mxu1 %v937_v17  ;;  %v906_v37 = vld [vmem:[%s1038_s8 + $0x64] ss:$8 sps:$4 sm:$0xff]   ;;  %v901_v38 = vld [vmem:[%s1038_s8 + $0x40] ss:$8 sps:$4 sm:$0xff]   ;;  %v907_v40 = vld [vmem:[%s1038_s8 + $0x54] ss:$8 sps:$4 sm:$0xff]  }
  0x29   : > { %v904_v39 = vld [vmem:[%s1038_s8 + $0x60] ss:$8 sps:$4 sm:$0xff]   ;;  %v909_v41 = vld [vmem:[%s1038_s8 + $0x74] ss:$8 sps:$4 sm:$0xff]   ;;  %v911_v42 = vld [vmem:[%s1038_s8 + $0x50] ss:$8 sps:$4 sm:$0xff]  }
  0x2a   : > { %v912_v43 = vld [vmem:[%s1038_s8 + $0x70] ss:$8 sps:$4 sm:$0xff]   ;;  %v830_v4 = vld [vmem:[%s1177_s2] ss:$0 sm:$0xff] }
  0x2b   : > { %385 = vmatpush1.bf16.msra.mxu0 %v1034_v19  ;;  %463 = vmatpush1.bf16.msra.mxu1 %v1034_v19 }
  0x2c   : > { %386 = vmatprep.subr.bf16.mxu0 %v937_v17  ;;  %464 = vmatprep.subr.bf16.mxu1 %v937_v17 }
  0x2f   : > { %387 = vmatpush1.bf16.msra.mxu0 %v1045_v20  ;;  %465 = vmatpush1.bf16.msra.mxu1 %v1045_v20 }
  0x30   : > { %388 = vmatprep.subr.bf16.mxu0 %v937_v17  ;;  %466 = vmatprep.subr.bf16.mxu1 %v937_v17 }
  0x33   : > { %389 = vmatpush1.bf16.msra.mxu0 %v1057_v23  ;;  %467 = vmatpush1.bf16.msra.mxu1 %v1057_v23 }
  0x34   : > { %390 = vmatprep.subr.bf16.mxu0 %v937_v17  ;;  %468 = vmatprep.subr.bf16.mxu1 %v937_v17 }
  0x37   : > { %391 = vmatpush1.bf16.msra.mxu0 %v1067_v24  ;;  %469 = vmatpush1.bf16.msra.mxu1 %v1067_v24 }
  0x38   : > { %392 = vmatprep.subr.bf16.mxu0 %v937_v17  ;;  %470 = vmatprep.subr.bf16.mxu1 %v937_v17 }
  0x3b   : > { %393 = vmatpush1.bf16.msra.mxu0 %v1076_v25  ;;  %471 = vmatpush1.bf16.msra.mxu1 %v1076_v25 }
  0x3c   : > { %394 = vmatprep.subr.bf16.mxu0 %v937_v17  ;;  %472 = vmatprep.subr.bf16.mxu1 %v937_v17 }
  0x3f   : > { %395 = vmatpush1.bf16.msra.mxu0 %v1085_v26  ;;  %473 = vmatpush1.bf16.msra.mxu1 %v1085_v26 }
  0x40   : > { %408 = vmatprep.subr.bf16.mxu0 %v937_v17  ;;  %486 = vmatprep.subr.bf16.mxu1 %v937_v17 }
  0x43   : > { %409 = vmatpush2.bf16.msra.mxu0 %v378_v28  ;;  %487 = vmatpush2.bf16.msra.mxu1 %v378_v28 }
  0x44   : > { %410 = vmatprep.subr.bf16.mxu0 %v937_v17  ;;  %488 = vmatprep.subr.bf16.mxu1 %v937_v17 }
  0x47   : > { %411 = vmatpush2.bf16.msra.mxu0 %v888_v29  ;;  %489 = vmatpush2.bf16.msra.mxu1 %v888_v29 }
  0x48   : > { %540 = vmatprep.subr.bf16.mxu0 %v937_v17  ;;  %622 = vmatprep.subr.bf16.mxu1 %v937_v17 }
  0x4a   : > { %413 = vmatmul.mubr.bf16.vlgmr.msra.gmra.mxu0 %v889_v30  ;;  %491 = vmatmul.mubr.bf16.vlgmr.msra.gmra.mxu1 %v892_v31 }
  0x4b   : > { %541 = vmatpush1.bf16.msra.mxu0 %v1015_v16  ;;  %623 = vmatpush1.bf16.msra.mxu1 %v1015_v16 }
  0x4c   : > { %542 = vmatprep.subr.bf16.mxu0 %v937_v17  ;;  %624 = vmatprep.subr.bf16.mxu1 %v937_v17 }
  0x4d   : > { %799 = vmatprep.mubr.msk.bf16.mxu0 %vm369_vm0, %v895_v32  ;;  %809 = vmatprep.mubr.msk.bf16.mxu1 %vm369_vm0, %v898_v33 }
  0x4f   : > { %543 = vmatpush1.bf16.msra.mxu0 %v1024_v18  ;;  %625 = vmatpush1.bf16.msra.mxu1 %v1024_v18 }
  0x50   : > { %544 = vmatprep.subr.bf16.mxu0 %v937_v17  ;;  %626 = vmatprep.subr.bf16.mxu1 %v937_v17 }
  0x52   : > { %421 = vmatmul.mubr.bf16.gmra.mxu0 %v897_v34  ;;  %499 = vmatmul.mubr.bf16.gmra.mxu1 %v900_v35 }
  0x53   : > { %545 = vmatpush1.bf16.msra.mxu0 %v1034_v19  ;;  %627 = vmatpush1.bf16.msra.mxu1 %v1034_v19 }
  0x54   : > { %546 = vmatprep.subr.bf16.mxu0 %v937_v17  ;;  %628 = vmatprep.subr.bf16.mxu1 %v937_v17 }
  0x55   : > { %818 = vmatprep.mubr.msk.bf16.mxu0 %vm369_vm0, %v903_v36  ;;  %828 = vmatprep.mubr.msk.bf16.mxu1 %vm369_vm0, %v906_v37 }
  0x57   : > { %547 = vmatpush1.bf16.msra.mxu0 %v1045_v20  ;;  %629 = vmatpush1.bf16.msra.mxu1 %v1045_v20 }
  0x58   : > { %548 = vmatprep.subr.bf16.mxu0 %v937_v17  ;;  %630 = vmatprep.subr.bf16.mxu1 %v937_v17 }
  0x5b   : > { %549 = vmatpush1.bf16.msra.mxu0 %v1057_v23  ;;  %631 = vmatpush1.bf16.msra.mxu1 %v1057_v23 }
  0x5c   : > { %550 = vmatprep.subr.bf16.mxu0 %v937_v17  ;;  %632 = vmatprep.subr.bf16.mxu1 %v937_v17 }
  0x5f   : > { %551 = vmatpush1.bf16.msra.mxu0 %v1067_v24  ;;  %633 = vmatpush1.bf16.msra.mxu1 %v1067_v24 }
  0x60   : > { %552 = vmatprep.subr.bf16.mxu0 %v937_v17  ;;  %634 = vmatprep.subr.bf16.mxu1 %v937_v17 }
  0x63   : > { %553 = vmatpush1.bf16.msra.mxu0 %v1076_v25  ;;  %635 = vmatpush1.bf16.msra.mxu1 %v1076_v25 }
  0x64   : > { %554 = vmatprep.subr.bf16.mxu0 %v937_v17  ;;  %636 = vmatprep.subr.bf16.mxu1 %v937_v17 }
  0x67   : > { %555 = vmatpush1.bf16.msra.mxu0 %v1085_v26  ;;  %637 = vmatpush1.bf16.msra.mxu1 %v1085_v26 }
  0x68   : > { %568 = vmatprep.subr.bf16.mxu0 %v937_v17  ;;  %650 = vmatprep.subr.bf16.mxu1 %v937_v17 }
  0x6b   : > { %569 = vmatpush2.bf16.msra.mxu0 %v378_v28  ;;  %651 = vmatpush2.bf16.msra.mxu1 %v378_v28 }
  0x6c   : > { %570 = vmatprep.subr.bf16.mxu0 %v937_v17  ;;  %652 = vmatprep.subr.bf16.mxu1 %v937_v17 }
  0x6f   : > { %571 = vmatpush2.bf16.msra.mxu0 %v888_v29  ;;  %653 = vmatpush2.bf16.msra.mxu1 %v888_v29 }
  0x72   : > { %573 = vmatmul.mubr.bf16.vlgmr.msra.gmra.mxu0 %v901_v38  ;;  %655 = vmatmul.mubr.bf16.vlgmr.msra.gmra.mxu1 %v904_v39 }
  0x73   : > { %819 = vmatprep.mubr.msk.bf16.mxu0 %vm369_vm0, %v907_v40  ;;  %829 = vmatprep.mubr.msk.bf16.mxu1 %vm369_vm0, %v909_v41 }
  0x7a   : > { %581 = vmatmul.mubr.bf16.gmra.mxu0 %v911_v42  ;;  %663 = vmatmul.mubr.bf16.gmra.mxu1 %v912_v43 }
 0x10a   : > { %v414_v44 = vpop.f32.mrf.mxu0  ;;  %v492_v45 = vpop.f32.mrf.mxu1 }
 0x10b   : > { %v507_v60 = vmax.f32 %v414_v44, %v492_v45 }
 0x10c   : > { %v416_v46 = vpop.f32.mrf.mxu0  ;;  %v494_v47 = vpop.f32.mrf.mxu1 }
 0x10e   : > { %v417_v48 = vpop.f32.mrf.mxu0  ;;  %v495_v49 = vpop.f32.mrf.mxu1 }
 0x10f   : > { %v508_v2 = vmax.f32 %v417_v48, %v495_v49 }
 0x110   : > { %v419_v50 = vpop.f32.mrf.mxu0  ;;  %v497_v51 = vpop.f32.mrf.mxu1 }
 0x112   : > { %v422_v52 = vpop.f32.mrf.mxu0  ;;  %v500_v53 = vpop.f32.mrf.mxu1 }
 0x113   : > { %v509_v10 = vmax.f32 %v422_v52, %v500_v53 }
 0x114   : > { %v424_v54 = vpop.f32.mrf.mxu0  ;;  %v502_v55 = vpop.f32.mrf.mxu1 }
 0x116   : > { %v425_v56 = vpop.f32.mrf.mxu0  ;;  %v503_v57 = vpop.f32.mrf.mxu1 }
 0x117   : > { %v510_v19 = vmax.f32 %v425_v56, %v503_v57 }
 0x118   : > { %v427_v58 = vpop.f32.mrf.mxu0  ;;  %v505_v59 = vpop.f32.mrf.mxu1 }
 0x132   : > { %v574_v61 = vpop.f32.mrf.mxu0  ;;  %v656_v62 = vpop.f32.mrf.mxu1 }
 0x133   : > { %v589_v63 = vmax.f32 %v507_v60, %v574_v61 }
 0x134   : > { %v576_v0 = vpop.f32.mrf.mxu0  ;;  %v658_v1 = vpop.f32.mrf.mxu1 }
 0x135   : > { %v671_v3 = vmax.f32 %v589_v63, %v656_v62 }
 0x136   : > { %v577_v5 = vpop.f32.mrf.mxu0  ;;  %v659_v6 = vpop.f32.mrf.mxu1 }
 0x137   : > { %v590_v7 = vmax.f32 %v508_v2, %v577_v5  ;;  %v682_v11 = vadd.f32 %v830_v4, %v671_v3 }
 0x138   : > { %v579_v8 = vpop.f32.mrf.mxu0  ;;  %v661_v9 = vpop.f32.mrf.mxu1 }
 0x139   : > { %v672_v12 = vmax.f32 %v590_v7, %v659_v6  ;;  %v686_v20 = vmax.f32 %v682_v11, 0.0 }
 0x13a   : > { %v582_v13 = vpop.f32.mrf.mxu0  ;;  %v664_v14 = vpop.f32.mrf.mxu1 }
 0x13b   : > { %v683_v15 = vadd.f32 %v830_v4, %v672_v12  ;;  %v591_v16 = vmax.f32 %v509_v10, %v582_v13 }
 0x13c   : > { %v584_v17 = vpop.f32.mrf.mxu0  ;;  %v666_v18 = vpop.f32.mrf.mxu1 }
 0x13d   : > { %v687_v21 = vmax.f32 %v683_v15, 0.0  ;;  %v673_v22 = vmax.f32 %v591_v16, %v664_v14 }
 0x13e   : > { %v585_v23 = vpop.f32.mrf.mxu0  ;;  %v667_v24 = vpop.f32.mrf.mxu1 }
 0x13f   : > { %v846_v25 = vpack.c.bf16 %v687_v21, %v686_v20  ;;  %v592_v26 = vmax.f32 %v510_v19, %v585_v23  ;;  %v684_v29 = vadd.f32 %v830_v4, %v673_v22 }
 0x140   : > { %v587_v27 = vpop.f32.mrf.mxu0  ;;  %v669_v28 = vpop.f32.mrf.mxu1 }
 0x141   : > { %847 = vst [vmem:[%s268_s5] sm:$0xff] %v846_v25   ;;  %v674_v30 = vmax.f32 %v592_v26, %v667_v24  ;;  %v688_v32 = vmax.f32 %v684_v29, 0.0 }
 0x143   : > { %v685_v31 = vadd.f32 %v830_v4, %v674_v30 }
 0x145   : > { %v689_v33 = vmax.f32 %v685_v31, 0.0 }
 0x147   : > { %v851_v34 = vpack.c.bf16 %v689_v33, %v688_v32 }
 0x149   : > { %853 = vst [vmem:[%s268_s5 + $0x8] sm:$0xff] %v851_v34  }
 0x14a PF: > { %p10_p9 = scmp.ge.s32.totalorder %s975_s16, 4   ;;  %s1179_s12 = smov %s931_s13 }
 0x14b   : > { %s1180_s13 = smov %s984_s19  ;;  %s1181_s14 = smov %s975_s16 }
 0x14c   :  { %12 = sbr.rel (!%p10_p9) target bundleno = 2 (0x2), region = 108 }

// kernel: lenet_forward.5
= control target key start
LH: loop header
LB: loop body
LE: loop exit
PB: predicated region body
PF: predicated region fallthrough
CT: control target
= control target key end

     0   :  { %v758_v0 = vmov 0   ;;  %vm257_vm0 = vcmask 130048   ;;  %v759_v30 = vmov 0.0   ;;  %vm760_vm1 = vmmov 0   ;;  %s978_s1 = inlined_call_operand.vmem [shape: bf16[400,128], index: 1, kind: input, shape index: {}]   ;;  %s979_s0 = inlined_call_operand.vmem [shape: bf16[16,400], index: 0, kind: input, shape index: {}]   ;;  %s980_s3 = inlined_call_operand.vmem [shape: bf16[128,128], index: 3, kind: input, shape index: {}]   ;;  %s981_s5 = inlined_call_operand.vmem [shape: bf16[128,128], index: 5, kind: input, shape index: {}]   ;;  %s982_s2 = inlined_call_operand.vmem [shape: f32[1,128], index: 2, kind: input, shape index: {}]   ;;  %s983_s4 = inlined_call_operand.vmem [shape: f32[1,128], index: 4, kind: input, shape index: {}]   ;;  %s984_s6 = inlined_call_operand.vmem [shape: f32[1,128], index: 6, kind: input, shape index: {}]   ;;  %s985_s7 = inlined_call_operand.vmem [shape: f32[16,128], index: 7, kind: output, shape index: {}]  }
   0x1   :  { %302 = vmatprep.subr.bf16.mxu1 %v758_v0  ;;  %v711_v1 = vld [vmem:[%s978_s1 + $0x78] sm:$0xff]   ;;  %v714_v4 = vld [vmem:[%s978_s1 + $0x70] sm:$0xff]   ;;  %v717_v7 = vld [vmem:[%s978_s1 + $0x68] sm:$0xff]  }
   0x2   :  { %v712_v2 = vld [vmem:[%s978_s1 + $0xb8] sm:$0xff]   ;;  %628 = vmatprep.subr.bf16.mxu0 %v711_v1  ;;  %v715_v5 = vld [vmem:[%s978_s1 + $0xb0] sm:$0xff]   ;;  %v718_v8 = vld [vmem:[%s978_s1 + $0xa8] sm:$0xff]  }
   0x3   :  { %v713_v3 = vld [vmem:[%s978_s1 + $0x38] sm:$0xff]   ;;  %303 = vmatpush1.bf16.msra.mxu1 %v712_v2  ;;  %v716_v6 = vld [vmem:[%s978_s1 + $0x30] sm:$0xff]   ;;  %v719_v9 = vld [vmem:[%s978_s1 + $0x28] sm:$0xff]  }
   0x4   :  { %629 = vmatpush3.bf16.msra.mxu0 %v713_v3  ;;  %304 = vmatprep.subr.bf16.mxu1 %v758_v0  ;;  %v720_v10 = vld [vmem:[%s978_s1 + $0x60] sm:$0xff]   ;;  %v723_v13 = vld [vmem:[%s978_s1 + $0x58] sm:$0xff]   ;;  %v726_v16 = vld [vmem:[%s978_s1 + $0x50] sm:$0xff]  }
   0x5   :  { %630 = vmatprep.subr.bf16.mxu0 %v714_v4  ;;  %v721_v11 = vld [vmem:[%s978_s1 + $0xa0] sm:$0xff]   ;;  %v724_v14 = vld [vmem:[%s978_s1 + $0x98] sm:$0xff]   ;;  %v727_v17 = vld [vmem:[%s978_s1 + $0x90] sm:$0xff]  }
   0x6   :  { %v722_v12 = vld [vmem:[%s978_s1 + $0x20] sm:$0xff]   ;;  %v725_v15 = vld [vmem:[%s978_s1 + $0x18] sm:$0xff]   ;;  %v728_v18 = vld [vmem:[%s978_s1 + $0x10] sm:$0xff]  }
   0x7   :  { %305 = vmatpush1.bf16.msra.mxu1 %v715_v5  ;;  %v729_v19 = vld [vmem:[%s978_s1 + $0x48] sm:$0xff]   ;;  %v732_v22 = vld [vmem:[%s978_s1 + $0x40] sm:$0xff]   ;;  %v742_v29 = vld [vmem:[%s980_s3 + $0x38] sm:$0xff]  }
   0x8   :  { %631 = vmatpush3.bf16.msra.mxu0 %v716_v6  ;;  %306 = vmatprep.subr.bf16.mxu1 %v758_v0  ;;  %v730_v20 = vld [vmem:[%s978_s1 + $0x88] sm:$0xff]   ;;  %v737_v23 = vld [vmem:[%s979_s0 + $0x4] ss:$16 sps:$4 sm:$0xff]   ;;  %v735_v27 = vld [vmem:[%s979_s0] ss:$16 sps:$4 sm:$0xff]  }
   0x9   :  { %632 = vmatprep.subr.bf16.mxu0 %v717_v7  ;;  %v731_v21 = vld [vmem:[%s978_s1 + $0x8] sm:$0xff]   ;;  %v733_v24 = vld [vmem:[%s978_s1 + $0x80] sm:$0xff]   ;;  %293 = vmatprep.mubr.bf16.mxu0 %v737_v23  ;;  %v743_v32 = vld [vmem:[%s980_s3 + $0x30] sm:$0xff]  }
   0xa   :  { %v741_v25 = vld [vmem:[%s979_s0 + $0xc] ss:$16 sps:$4 sm:$0xff]   ;;  %v734_v26 = vld [vmem:[%s978_s1] sm:$0xff]   ;;  %v739_v31 = vld [vmem:[%s979_s0 + $0x8] ss:$16 sps:$4 sm:$0xff]  }
   0xb   :  { %307 = vmatpush1.bf16.msra.mxu1 %v718_v8  ;;  %609 = vmatprep.mubr.msk.bf16.mxu1 %vm257_vm0, %v741_v25  ;;  %v738_v28 = vld [vmem:[%s978_s1 + $0xc0] sm:$0xff]   ;;  %v744_v33 = vld [vmem:[%s980_s3 + $0x28] sm:$0xff]   ;;  %v746_v35 = vld [vmem:[%s980_s3 + $0x18] sm:$0xff]  }
   0xc   :  { %633 = vmatpush3.bf16.msra.mxu0 %v719_v9  ;;  %308 = vmatprep.subr.bf16.mxu1 %v758_v0  ;;  %v745_v34 = vld [vmem:[%s980_s3 + $0x20] sm:$0xff]   ;;  %v747_v36 = vld [vmem:[%s980_s3 + $0x10] sm:$0xff]   ;;  %v748_v37 = vld [vmem:[%s980_s3 + $0x8] sm:$0xff]  }
   0xd   :  { %634 = vmatprep.subr.bf16.mxu0 %v720_v10  ;;  %v749_v38 = vld [vmem:[%s980_s3] sm:$0xff]   ;;  %v750_v39 = vld [vmem:[%s981_s5 + $0x38] sm:$0xff]   ;;  %v751_v40 = vld [vmem:[%s981_s5 + $0x30] sm:$0xff]  }
   0xe   :  { %v752_v41 = vld [vmem:[%s981_s5 + $0x28] sm:$0xff]   ;;  %v753_v42 = vld [vmem:[%s981_s5 + $0x20] sm:$0xff]   ;;  %v754_v43 = vld [vmem:[%s981_s5 + $0x18] sm:$0xff]  }
   0xf   :  { %309 = vmatpush1.bf16.msra.mxu1 %v721_v11  ;;  %v579_v46 = vld [vmem:[%s982_s2] ss:$0 sm:$0xff]  ;;  %v755_v62 = vld [vmem:[%s981_s5 + $0x10] sm:$0xff]   ;;  %v756_v63 = vld [vmem:[%s981_s5 + $0x8] sm:$0xff]  }
  0x10   :  { %635 = vmatpush3.bf16.msra.mxu0 %v722_v12  ;;  %310 = vmatprep.subr.bf16.mxu1 %v758_v0  ;;  %v610_v1 = vld [vmem:[%s983_s4] ss:$0 sm:$0xff] }
  0x11   :  { %636 = vmatprep.subr.bf16.mxu0 %v723_v13  ;;  %v619_v11 = vld [vmem:[%s984_s6] ss:$0 sm:$0xff] }
  0x13   :  { %311 = vmatpush1.bf16.msra.mxu1 %v724_v14 }
  0x14   :  { %637 = vmatpush3.bf16.msra.mxu0 %v725_v15  ;;  %312 = vmatprep.subr.bf16.mxu1 %v758_v0 }
  0x15   :  { %638 = vmatprep.subr.bf16.mxu0 %v726_v16 }
  0x17   :  { %313 = vmatpush1.bf16.msra.mxu1 %v727_v17 }
  0x18   :  { %639 = vmatpush3.bf16.msra.mxu0 %v728_v18  ;;  %314 = vmatprep.subr.bf16.mxu1 %v758_v0 }
  0x19   :  { %640 = vmatprep.subr.bf16.mxu0 %v729_v19 }
  0x1b   :  { %315 = vmatpush1.bf16.msra.mxu1 %v730_v20 }
  0x1c   :  { %641 = vmatpush3.bf16.msra.mxu0 %v731_v21  ;;  %316 = vmatprep.subr.bf16.mxu1 %v758_v0 }
  0x1d   :  { %642 = vmatprep.subr.bf16.mxu0 %v732_v22 }
  0x1f   :  { %317 = vmatpush1.bf16.msra.mxu1 %v733_v24 }
  0x20   :  { %643 = vmatpush3.bf16.msra.mxu0 %v734_v26  ;;  %332 = vmatprep.subr.bf16.mxu1 %v758_v0  ;;  %v757_v0 = vld [vmem:[%s981_s5] sm:$0xff]  }
  0x21   :  { %668 = vmatprep.subr.bf16.mxu0 %v759_v30 }
  0x23   :  { %294 = vmatmul.mubr.bf16.vlgmr.msra.gmra.mxu0 %v735_v27  ;;  %333 = vmatpush2.bf16.msra.mxu1 %v738_v28 }
  0x24   :  { %669 = vmatpush3.bf16.msra.mxu0 %v742_v29  ;;  %688 = vmatprep.subr.bf16.mxu1 %v759_v30 }
  0x25   :  { %670 = vmatprep.subr.bf16.mxu0 %v759_v30  ;;  %684 = vmatprep.mubr.msk.bf16.mxu0 %vm760_vm1, %v759_v30 }
  0x26   :  { %335 = vmatmul.mubr.bf16.vlgmr.msra.gmra.mxu1 %v739_v31 }
  0x27   :  { %704 = vmatprep.mubr.msk.bf16.mxu1 %vm760_vm1, %v759_v30  ;;  %689 = vmatpush3.bf16.msra.mxu1 %v750_v39 }
  0x28   :  { %671 = vmatpush3.bf16.msra.mxu0 %v743_v32  ;;  %690 = vmatprep.subr.bf16.mxu1 %v759_v30 }
  0x29   :  { %672 = vmatprep.subr.bf16.mxu0 %v759_v30 }
  0x2b   :  { %691 = vmatpush3.bf16.msra.mxu1 %v751_v40 }
  0x2c   :  { %673 = vmatpush3.bf16.msra.mxu0 %v744_v33  ;;  %692 = vmatprep.subr.bf16.mxu1 %v759_v30 }
  0x2d   :  { %674 = vmatprep.subr.bf16.mxu0 %v759_v30 }
  0x2f   :  { %693 = vmatpush3.bf16.msra.mxu1 %v752_v41 }
  0x30   :  { %675 = vmatpush3.bf16.msra.mxu0 %v745_v34  ;;  %694 = vmatprep.subr.bf16.mxu1 %v759_v30 }
  0x31   :  { %676 = vmatprep.subr.bf16.mxu0 %v759_v30 }
  0x33   :  { %695 = vmatpush3.bf16.msra.mxu1 %v753_v42 }
  0x34   :  { %677 = vmatpush3.bf16.msra.mxu0 %v746_v35  ;;  %696 = vmatprep.subr.bf16.mxu1 %v759_v30 }
  0x35   :  { %678 = vmatprep.subr.bf16.mxu0 %v759_v30 }
  0x37   :  { %697 = vmatpush3.bf16.msra.mxu1 %v754_v43 }
  0x38   :  { %679 = vmatpush3.bf16.msra.mxu0 %v747_v36  ;;  %698 = vmatprep.subr.bf16.mxu1 %v759_v30 }
  0x39   :  { %680 = vmatprep.subr.bf16.mxu0 %v759_v30 }
  0x3b   :  { %699 = vmatpush3.bf16.msra.mxu1 %v755_v62 }
  0x3c   :  { %681 = vmatpush3.bf16.msra.mxu0 %v748_v37  ;;  %700 = vmatprep.subr.bf16.mxu1 %v759_v30 }
  0x3d   :  { %682 = vmatprep.subr.bf16.mxu0 %v759_v30 }
  0x3f   :  { %701 = vmatpush3.bf16.msra.mxu1 %v756_v63 }
  0x40   :  { %683 = vmatpush3.bf16.msra.mxu0 %v749_v38  ;;  %702 = vmatprep.subr.bf16.mxu1 %v759_v30 }
  0x43   :  { %703 = vmatpush3.bf16.msra.mxu1 %v757_v0 }
  0xe3   :  { %v644_v44 = vpop.f32.mrf.mxu0 }
  0xe5   :  { %v645_v45 = vpop.f32.mrf.mxu0 }
  0xe6   :  { %v646_v47 = vadd.f32 %v645_v45, %v644_v44  ;;  %v336_v48 = vpop.f32.mrf.mxu1 }
  0xe7   :  { %v647_v49 = vpop.f32.mrf.mxu0 }
  0xe8   :  { %v296_v50 = vadd.f32 %v646_v47, %v579_v46  ;;  %v338_v51 = vpop.f32.mrf.mxu1 }
  0xe9   :  { %v648_v52 = vpop.f32.mrf.mxu0 }
  0xea   :  { %v649_v53 = vadd.f32 %v648_v52, %v647_v49  ;;  %v339_v54 = vpop.f32.mrf.mxu1  ;;  %v337_v55 = vadd.f32 %v336_v48, %v296_v50 }
  0xec   :  { %v299_v56 = vadd.f32 %v649_v53, %v579_v46  ;;  %v341_v57 = vpop.f32.mrf.mxu1  ;;  %v343_v59 = vmax.f32 %v337_v55, 0.0 }
  0xee   :  { %v340_v58 = vadd.f32 %v339_v54, %v299_v56 }
  0xf0   :  { %v344_v60 = vmax.f32 %v340_v58, 0.0 }
  0xf2   :  { %v345_v61 = vpack.c.bf16 %v344_v60, %v343_v59 }
  0xf4   :  { %685 = vmatmul.mubr.bf16.vlgmr.msra.gmra.mxu0 %v345_v61 }
 0x1b4   :  { %v451_v2 = vpop.f32.mrf.mxu0 }
 0x1b5   :  { %v452_v4 = vadd.f32 %v610_v1, %v451_v2 }
 0x1b6   :  { %v686_v3 = vpop.f32.mrf.mxu0 }
 0x1b7   :  { %v458_v8 = vmax.f32 %v452_v4, 0.0 }
 0x1b8   :  { %v454_v5 = vpop.f32.mrf.mxu0 }
 0x1b9   :  { %v455_v6 = vadd.f32 %v610_v1, %v454_v5 }
 0x1ba   :  { %v687_v7 = vpop.f32.mrf.mxu0 }
 0x1bb   :  { %v459_v9 = vmax.f32 %v455_v6, 0.0 }
 0x1bd   :  { %v460_v10 = vpack.c.bf16 %v459_v9, %v458_v8 }
 0x1bf   :  { %705 = vmatmul.mubr.bf16.vlgmr.msra.gmra.mxu1 %v460_v10 }
 0x27f   :  { %v566_v12 = vpop.f32.mrf.mxu1 }
 0x280   :  { %v567_v13 = vadd.f32 %v619_v11, %v566_v12 }
 0x281   :  { %v706_v14 = vpop.f32.mrf.mxu1 }
 0x282   :  { %573 = vst [vmem:[%s985_s7] sm:$0xff] %v567_v13 }
 0x283   :  { %v569_v15 = vpop.f32.mrf.mxu1 }
 0x284   :  { %v570_v16 = vadd.f32 %v619_v11, %v569_v15 }
 0x285   :  { %v707_v17 = vpop.f32.mrf.mxu1 }
 0x286   :  { %574 = vst [vmem:[%s985_s7 + $0x8] sm:$0xff] %v570_v16 }

</bundles_post_ra>
